<compile_context>
chip_gen: v7x
topology: tpu7x:2x2x1
jax: 0.10.0
libtpu: 0.0.40
codegen_flags: <defaults>
</compile_context>

<pallas_src>
import jax
import jax.numpy as jnp
from jax.experimental import pallas as pl
from jax.experimental.pallas import tpu as pltpu


def _make_ln_kernel(C, K, TC):
    """Builds the kernel body for static (C, K, chunk-size TC)."""

    def kernel(w_ref, b_ref, xm_ref, xh_ref, o_ref):
        # w_ref:  (C*K,) f32 SMEM        -- conv weights, row-major (c, k)
        # b_ref:  (1,)   f32 SMEM        -- conv bias
        # xm_ref: (C, Nt, Tt)   f32 VMEM -- main input tile (time left-padded)
        # xh_ref: (C, Nt, HALO) f32 VMEM -- right halo (next HALO padded lanes)
        # o_ref:  (Nt, Tt)      f32 VMEM -- output tile
        _, Nt, Tt = xm_ref.shape
        halo = xh_ref.shape[-1]
        n_chunks = Tt // TC                      # host guarantees Tt % TC == 0
        NB = 8 if Nt % 8 == 0 else Nt            # sublane group
        n_sub = Nt // NB

        # Static unroll: n_chunks <= 4, n_sub <= 8, and C*K is small for this
        # model; for very large C*K this would become a fori_loop over taps.
        for tc in range(n_chunks):
            t0 = tc * TC
            last = tc == n_chunks - 1
            for nb in range(n_sub):
                r0 = nb * NB
                # Bias folded into the accumulator init (no separate add pass).
                acc = jnp.full((NB, TC), b_ref[0], dtype=jnp.float32)
                for c in range(C):
                    # One register-resident slab per (channel, chunk); the K
                    # shifted tap windows are static slices of this value.
                    if last:
                        slab = jnp.concatenate(
                            [xm_ref[c, pl.ds(r0, NB), pl.ds(t0, TC)],
                             xh_ref[c, pl.ds(r0, NB), :]],
                            axis=-1)                                 # (NB, TC+HALO)
                    else:
                        slab = xm_ref[c, pl.ds(r0, NB), pl.ds(t0, TC + halo)]
                    base = c * K
                    for k in range(K):
                        acc = acc + w_ref[base + k] * slab[:, k:k + TC]
                o_ref[pl.ds(r0, NB), pl.ds(t0, TC)] = jnp.maximum(acc, 0.0)

    return kernel


def ln_baseline_forward(x, weight, bias, *, tmin, tmax, sfreq):
    """x: (N, C, T) f32, weight: (1, C, K) f32, bias: (1,) f32 -> (N, 1, T)."""
    past = int(sfreq * tmax)
    future = int(sfreq * tmin)
    K = past + future
    padding = past - 1
    extra = padding - future
    assert extra > 0, "module relies on extra_samples > 0 for the [:-extra] trim"

    N, C, T = x.shape
    assert weight.shape[-2] == C and weight.shape[-1] == K
    T_out = (T + 2 * padding - K + 1) - extra          # == T for this module

    # ---- tiling --------------------------------------------------------------
    HALO = 128 * max(1, pl.cdiv(K - 1, 128))           # lane-aligned right halo
    TC = HALO * max(1, 512 // HALO)                    # in-kernel chunk (>= HALO)
    t_blocks = max(1, min(pl.cdiv(T_out, TC), max(1, 2048 // TC)))
    Tt = TC * t_blocks                                 # time tile (<= ~2048 lanes)

    Np = 8 * pl.cdiv(N, 8)                             # batch padded to sublanes
    if Np <= 64:
        Nt = Np
    elif Np % 64 == 0:
        Nt = 64
    elif Np % 32 == 0:
        Nt = 32
    elif Np % 16 == 0:
        Nt = 16
    else:
        Nt = 8

    # Keep one buffer set well under ~8 MiB so 2-3x buffering fits the 32 MiB
    # scoped budget on every generation (only triggers for very large C).
    while 4 * (C * Nt * (Tt + HALO) + Nt * Tt) > 8 * 2**20 and Tt > TC:
        Tt -= TC
    num_t = pl.cdiv(T_out, Tt)
    num_n = Np // Nt

    # ---- host-side layout: (C, Np, Lp) + conv zero pad + tile alignment ------
    Lp = num_t * Tt + HALO
    # TODO(synk): replace this transpose+pad with in-kernel DMA/masking.
    x_cnt = jnp.transpose(x.astype(jnp.float32), (1, 0, 2))            # (C, N, T)
    x_pad = jnp.pad(x_cnt, ((0, 0), (0, Np - N), (padding, Lp - padding - T)))

    w_flat = weight.astype(jnp.float32).reshape(C * K)                 # (c, k)
    b_vec = bias.astype(jnp.float32).reshape(1)

    # ---- VMEM budget / scheduling hints --------------------------------------
    tile_bytes = 4 * (C * Nt * (Tt + HALO) + Nt * Tt)
    vmem_limit = int(min(32 * 2**20, max(16 * 2**20, 3 * tile_bytes)))
    cost = pl.CostEstimate(
        flops=2 * N * T_out * C * K,
        transcendentals=0,
        bytes_accessed=int(x_pad.size) * 4 + Np * num_t * Tt * 4 + (C * K + 1) * 4,
    )

    halo_step = Tt // HALO
    kernel = _make_ln_kernel(C, K, TC)

    out_padded = pl.pallas_call(
        kernel,
        out_shape=jax.ShapeDtypeStruct((Np, num_t * Tt), jnp.float32),
        grid=(num_n, num_t),
        in_specs=[
            pl.BlockSpec(memory_space=pltpu.MemorySpace.SMEM),          # weights
            pl.BlockSpec(memory_space=pltpu.MemorySpace.SMEM),          # bias
            pl.BlockSpec((C, Nt, Tt), lambda i, j: (0, i, j)),          # main tile
            pl.BlockSpec((C, Nt, HALO),
                         lambda i, j: (0, i, (j + 1) * halo_step)),     # right halo
        ],
        out_specs=pl.BlockSpec((Nt, Tt), lambda i, j: (i, j)),
        compiler_params=pltpu.CompilerParams(
            dimension_semantics=("parallel", "parallel"),
            vmem_limit_bytes=vmem_limit,
        ),
        cost_estimate=cost,
    )(w_flat, b_vec, x_pad, x_pad)

    return out_padded[:N, :T_out].reshape(N, 1, T_out)


def _reference(x, weight, bias, *, tmin, tmax, sfreq):
    """Pure-JAX reference mirroring the PyTorch forward exactly."""
    past = int(sfreq * tmax)
    future = int(sfreq * tmin)
    padding = past - 1
    extra = padding - future
    out = jax.lax.conv_general_dilated(
        x, weight,
        window_strides=(1,),
        padding=[(padding, padding)],
        dimension_numbers=("NCH", "OIH", "NCH"),
    ) + bias.reshape(1, 1, 1)
    out = out[..., :-extra]
    return jnp.maximum(out, 0.0)


if __name__ == "__main__":
    # Config: in_channels=4, sfreq=8, tmax=1.0, tmin=0.25
    #   -> past=8, future=2, K=10, padding=7, extra_samples=5
    in_channels, sfreq, tmax, tmin = 4, 8, 1.0, 0.25
    K = int(sfreq * tmax) + int(sfreq * tmin)

    key = jax.random.PRNGKey(0)
    kx, kw, kb, kx2 = jax.random.split(key, 4)

    # Conv1d-style init: U(-1/sqrt(C*K), 1/sqrt(C*K))
    bound = 1.0 / float(jnp.sqrt(in_channels * K))
    weight = jax.random.uniform(kw, (1, in_channels, K), jnp.float32, -bound, bound)
    bias = jax.random.uniform(kb, (1,), jnp.float32, -bound, bound)

    fwd = jax.jit(lambda a, w, b: ln_baseline_forward(
        a, w, b, tmin=tmin, tmax=tmax, sfreq=sfreq))

    # Test 1: small shape (single tile, single in-kernel chunk).
    x1 = jax.random.normal(kx, (2, in_channels, 32), dtype=jnp.float32)
    o1 = jax.block_until_ready(fwd(x1, weight, bias))
    r1 = _reference(x1, weight, bias, tmin=tmin, tmax=tmax, sfreq=sfreq)
    assert o1.shape == r1.shape == (2, 1, 32)
    assert jnp.allclose(o1, r1, atol=3e-5, rtol=3e-5)

    # Test 2: N % 8 != 0, multiple time tiles and in-kernel chunks
    # (exercises batch padding, the halo across the tile boundary, and both
    # the interior-chunk and last-chunk paths).
    x2 = jax.random.normal(kx2, (3, in_channels, 2600), dtype=jnp.float32)
    o2 = jax.block_until_ready(fwd(x2, weight, bias))
    r2 = _reference(x2, weight, bias, tmin=tmin, tmax=tmax, sfreq=sfreq)
    assert o2.shape == r2.shape == (3, 1, 2600)
    assert jnp.allclose(o2, r2, atol=3e-5, rtol=3e-5)

    print("KERNEL_OK")
</pallas_src>

<mosaic_0001>
module attributes {stable_mosaic.version = 11 : i64} {
  func.func @kernel(%arg0: i32, %arg1: i32, %arg2: memref<40xf32, #tpu.memory_space<smem>>, %arg3: memref<1xf32, #tpu.memory_space<smem>>, %arg4: memref<4x8x512xf32, #tpu.memory_space<vmem>>, %arg5: memref<4x8x128xf32, #tpu.memory_space<vmem>>, %arg6: memref<8x512xf32, #tpu.memory_space<vmem>>) attributes {dimension_semantics = [#tpu.dimension_semantics<parallel>, #tpu.dimension_semantics<parallel>], iteration_bounds = array<i64: 1, 1>, scalar_prefetch = 0 : i64, scratch_operands = 0 : i64, tpu.core_type = #tpu.core_type<tc>, window_params = [{transform_indices = @transform_0, window_bounds = array<i64: 40>}, {transform_indices = @transform_1, window_bounds = array<i64: 1>}, {transform_indices = @transform_2, window_bounds = array<i64: 4, 8, 512>}, {transform_indices = @transform_3, window_bounds = array<i64: 4, 8, 128>}, {transform_indices = @transform_4, window_bounds = array<i64: 8, 512>}]} {
    %c0 = arith.constant 0 : index
    %0 = memref.load %arg3[%c0] : memref<1xf32, #tpu.memory_space<smem>>
    %1 = vector.broadcast %0 : f32 to vector<8x512xf32>
    %c0_0 = arith.constant 0 : index
    %c0_1 = arith.constant 0 : index
    %c0_2 = arith.constant 0 : index
    %2 = vector.load %arg4[%c0_0, %c0_1, %c0_2] : memref<4x8x512xf32, #tpu.memory_space<vmem>>, vector<1x8x512xf32>
    %3 = vector.shape_cast %2 : vector<1x8x512xf32> to vector<8x512xf32>
    %c0_3 = arith.constant 0 : index
    %c0_4 = arith.constant 0 : index
    %c0_5 = arith.constant 0 : index
    %4 = vector.load %arg5[%c0_3, %c0_4, %c0_5] : memref<4x8x128xf32, #tpu.memory_space<vmem>>, vector<1x8x128xf32>
    %5 = vector.shape_cast %4 : vector<1x8x128xf32> to vector<8x128xf32>
    %6 = tpu.concatenate %3, %5 in 1 : vector<8x512xf32>, vector<8x128xf32> -> vector<8x640xf32>
    %c0_6 = arith.constant 0 : index
    %7 = memref.load %arg2[%c0_6] : memref<40xf32, #tpu.memory_space<smem>>
    %8 = vector.extract_strided_slice %6 {offsets = [0, 0], sizes = [8, 512], strides = [1, 1]} : vector<8x640xf32> to vector<8x512xf32>
    %9 = vector.broadcast %7 : f32 to vector<8x512xf32>
    %10 = arith.mulf %9, %8 : vector<8x512xf32>
    %11 = arith.addf %1, %10 : vector<8x512xf32>
    %c1 = arith.constant 1 : index
    %12 = memref.load %arg2[%c1] : memref<40xf32, #tpu.memory_space<smem>>
    %13 = vector.extract_strided_slice %6 {offsets = [0, 1], sizes = [8, 512], strides = [1, 1]} : vector<8x640xf32> to vector<8x512xf32>
    %14 = vector.broadcast %12 : f32 to vector<8x512xf32>
    %15 = arith.mulf %14, %13 : vector<8x512xf32>
    %16 = arith.addf %11, %15 : vector<8x512xf32>
    %c2 = arith.constant 2 : index
    %17 = memref.load %arg2[%c2] : memref<40xf32, #tpu.memory_space<smem>>
    %18 = vector.extract_strided_slice %6 {offsets = [0, 2], sizes = [8, 512], strides = [1, 1]} : vector<8x640xf32> to vector<8x512xf32>
    %19 = vector.broadcast %17 : f32 to vector<8x512xf32>
    %20 = arith.mulf %19, %18 : vector<8x512xf32>
    %21 = arith.addf %16, %20 : vector<8x512xf32>
    %c3 = arith.constant 3 : index
    %22 = memref.load %arg2[%c3] : memref<40xf32, #tpu.memory_space<smem>>
    %23 = vector.extract_strided_slice %6 {offsets = [0, 3], sizes = [8, 512], strides = [1, 1]} : vector<8x640xf32> to vector<8x512xf32>
    %24 = vector.broadcast %22 : f32 to vector<8x512xf32>
    %25 = arith.mulf %24, %23 : vector<8x512xf32>
    %26 = arith.addf %21, %25 : vector<8x512xf32>
    %c4 = arith.constant 4 : index
    %27 = memref.load %arg2[%c4] : memref<40xf32, #tpu.memory_space<smem>>
    %28 = vector.extract_strided_slice %6 {offsets = [0, 4], sizes = [8, 512], strides = [1, 1]} : vector<8x640xf32> to vector<8x512xf32>
    %29 = vector.broadcast %27 : f32 to vector<8x512xf32>
    %30 = arith.mulf %29, %28 : vector<8x512xf32>
    %31 = arith.addf %26, %30 : vector<8x512xf32>
    %c5 = arith.constant 5 : index
    %32 = memref.load %arg2[%c5] : memref<40xf32, #tpu.memory_space<smem>>
    %33 = vector.extract_strided_slice %6 {offsets = [0, 5], sizes = [8, 512], strides = [1, 1]} : vector<8x640xf32> to vector<8x512xf32>
    %34 = vector.broadcast %32 : f32 to vector<8x512xf32>
    %35 = arith.mulf %34, %33 : vector<8x512xf32>
    %36 = arith.addf %31, %35 : vector<8x512xf32>
    %c6 = arith.constant 6 : index
    %37 = memref.load %arg2[%c6] : memref<40xf32, #tpu.memory_space<smem>>
    %38 = vector.extract_strided_slice %6 {offsets = [0, 6], sizes = [8, 512], strides = [1, 1]} : vector<8x640xf32> to vector<8x512xf32>
    %39 = vector.broadcast %37 : f32 to vector<8x512xf32>
    %40 = arith.mulf %39, %38 : vector<8x512xf32>
    %41 = arith.addf %36, %40 : vector<8x512xf32>
    %c7 = arith.constant 7 : index
    %42 = memref.load %arg2[%c7] : memref<40xf32, #tpu.memory_space<smem>>
    %43 = vector.extract_strided_slice %6 {offsets = [0, 7], sizes = [8, 512], strides = [1, 1]} : vector<8x640xf32> to vector<8x512xf32>
    %44 = vector.broadcast %42 : f32 to vector<8x512xf32>
    %45 = arith.mulf %44, %43 : vector<8x512xf32>
    %46 = arith.addf %41, %45 : vector<8x512xf32>
    %c8 = arith.constant 8 : index
    %47 = memref.load %arg2[%c8] : memref<40xf32, #tpu.memory_space<smem>>
    %48 = vector.extract_strided_slice %6 {offsets = [0, 8], sizes = [8, 512], strides = [1, 1]} : vector<8x640xf32> to vector<8x512xf32>
    %49 = vector.broadcast %47 : f32 to vector<8x512xf32>
    %50 = arith.mulf %49, %48 : vector<8x512xf32>
    %51 = arith.addf %46, %50 : vector<8x512xf32>
    %c9 = arith.constant 9 : index
    %52 = memref.load %arg2[%c9] : memref<40xf32, #tpu.memory_space<smem>>
    %53 = vector.extract_strided_slice %6 {offsets = [0, 9], sizes = [8, 512], strides = [1, 1]} : vector<8x640xf32> to vector<8x512xf32>
    %54 = vector.broadcast %52 : f32 to vector<8x512xf32>
    %55 = arith.mulf %54, %53 : vector<8x512xf32>
    %56 = arith.addf %51, %55 : vector<8x512xf32>
    %c1_7 = arith.constant 1 : index
    %c0_8 = arith.constant 0 : index
    %c0_9 = arith.constant 0 : index
    %57 = vector.load %arg4[%c1_7, %c0_8, %c0_9] : memref<4x8x512xf32, #tpu.memory_space<vmem>>, vector<1x8x512xf32>
    %58 = vector.shape_cast %57 : vector<1x8x512xf32> to vector<8x512xf32>
    %c1_10 = arith.constant 1 : index
    %c0_11 = arith.constant 0 : index
    %c0_12 = arith.constant 0 : index
    %59 = vector.load %arg5[%c1_10, %c0_11, %c0_12] : memref<4x8x128xf32, #tpu.memory_space<vmem>>, vector<1x8x128xf32>
    %60 = vector.shape_cast %59 : vector<1x8x128xf32> to vector<8x128xf32>
    %61 = tpu.concatenate %58, %60 in 1 : vector<8x512xf32>, vector<8x128xf32> -> vector<8x640xf32>
    %c10 = arith.constant 10 : index
    %62 = memref.load %arg2[%c10] : memref<40xf32, #tpu.memory_space<smem>>
    %63 = vector.extract_strided_slice %61 {offsets = [0, 0], sizes = [8, 512], strides = [1, 1]} : vector<8x640xf32> to vector<8x512xf32>
    %64 = vector.broadcast %62 : f32 to vector<8x512xf32>
    %65 = arith.mulf %64, %63 : vector<8x512xf32>
    %66 = arith.addf %56, %65 : vector<8x512xf32>
    %c11 = arith.constant 11 : index
    %67 = memref.load %arg2[%c11] : memref<40xf32, #tpu.memory_space<smem>>
    %68 = vector.extract_strided_slice %61 {offsets = [0, 1], sizes = [8, 512], strides = [1, 1]} : vector<8x640xf32> to vector<8x512xf32>
    %69 = vector.broadcast %67 : f32 to vector<8x512xf32>
    %70 = arith.mulf %69, %68 : vector<8x512xf32>
    %71 = arith.addf %66, %70 : vector<8x512xf32>
    %c12 = arith.constant 12 : index
    %72 = memref.load %arg2[%c12] : memref<40xf32, #tpu.memory_space<smem>>
    %73 = vector.extract_strided_slice %61 {offsets = [0, 2], sizes = [8, 512], strides = [1, 1]} : vector<8x640xf32> to vector<8x512xf32>
    %74 = vector.broadcast %72 : f32 to vector<8x512xf32>
    %75 = arith.mulf %74, %73 : vector<8x512xf32>
    %76 = arith.addf %71, %75 : vector<8x512xf32>
    %c13 = arith.constant 13 : index
    %77 = memref.load %arg2[%c13] : memref<40xf32, #tpu.memory_space<smem>>
    %78 = vector.extract_strided_slice %61 {offsets = [0, 3], sizes = [8, 512], strides = [1, 1]} : vector<8x640xf32> to vector<8x512xf32>
    %79 = vector.broadcast %77 : f32 to vector<8x512xf32>
    %80 = arith.mulf %79, %78 : vector<8x512xf32>
    %81 = arith.addf %76, %80 : vector<8x512xf32>
    %c14 = arith.constant 14 : index
    %82 = memref.load %arg2[%c14] : memref<40xf32, #tpu.memory_space<smem>>
    %83 = vector.extract_strided_slice %61 {offsets = [0, 4], sizes = [8, 512], strides = [1, 1]} : vector<8x640xf32> to vector<8x512xf32>
    %84 = vector.broadcast %82 : f32 to vector<8x512xf32>
    %85 = arith.mulf %84, %83 : vector<8x512xf32>
    %86 = arith.addf %81, %85 : vector<8x512xf32>
    %c15 = arith.constant 15 : index
    %87 = memref.load %arg2[%c15] : memref<40xf32, #tpu.memory_space<smem>>
    %88 = vector.extract_strided_slice %61 {offsets = [0, 5], sizes = [8, 512], strides = [1, 1]} : vector<8x640xf32> to vector<8x512xf32>
    %89 = vector.broadcast %87 : f32 to vector<8x512xf32>
    %90 = arith.mulf %89, %88 : vector<8x512xf32>
    %91 = arith.addf %86, %90 : vector<8x512xf32>
    %c16 = arith.constant 16 : index
    %92 = memref.load %arg2[%c16] : memref<40xf32, #tpu.memory_space<smem>>
    %93 = vector.extract_strided_slice %61 {offsets = [0, 6], sizes = [8, 512], strides = [1, 1]} : vector<8x640xf32> to vector<8x512xf32>
    %94 = vector.broadcast %92 : f32 to vector<8x512xf32>
    %95 = arith.mulf %94, %93 : vector<8x512xf32>
    %96 = arith.addf %91, %95 : vector<8x512xf32>
    %c17 = arith.constant 17 : index
    %97 = memref.load %arg2[%c17] : memref<40xf32, #tpu.memory_space<smem>>
    %98 = vector.extract_strided_slice %61 {offsets = [0, 7], sizes = [8, 512], strides = [1, 1]} : vector<8x640xf32> to vector<8x512xf32>
    %99 = vector.broadcast %97 : f32 to vector<8x512xf32>
    %100 = arith.mulf %99, %98 : vector<8x512xf32>
    %101 = arith.addf %96, %100 : vector<8x512xf32>
    %c18 = arith.constant 18 : index
    %102 = memref.load %arg2[%c18] : memref<40xf32, #tpu.memory_space<smem>>
    %103 = vector.extract_strided_slice %61 {offsets = [0, 8], sizes = [8, 512], strides = [1, 1]} : vector<8x640xf32> to vector<8x512xf32>
    %104 = vector.broadcast %102 : f32 to vector<8x512xf32>
    %105 = arith.mulf %104, %103 : vector<8x512xf32>
    %106 = arith.addf %101, %105 : vector<8x512xf32>
    %c19 = arith.constant 19 : index
    %107 = memref.load %arg2[%c19] : memref<40xf32, #tpu.memory_space<smem>>
    %108 = vector.extract_strided_slice %61 {offsets = [0, 9], sizes = [8, 512], strides = [1, 1]} : vector<8x640xf32> to vector<8x512xf32>
    %109 = vector.broadcast %107 : f32 to vector<8x512xf32>
    %110 = arith.mulf %109, %108 : vector<8x512xf32>
    %111 = arith.addf %106, %110 : vector<8x512xf32>
    %c2_13 = arith.constant 2 : index
    %c0_14 = arith.constant 0 : index
    %c0_15 = arith.constant 0 : index
    %112 = vector.load %arg4[%c2_13, %c0_14, %c0_15] : memref<4x8x512xf32, #tpu.memory_space<vmem>>, vector<1x8x512xf32>
    %113 = vector.shape_cast %112 : vector<1x8x512xf32> to vector<8x512xf32>
    %c2_16 = arith.constant 2 : index
    %c0_17 = arith.constant 0 : index
    %c0_18 = arith.constant 0 : index
    %114 = vector.load %arg5[%c2_16, %c0_17, %c0_18] : memref<4x8x128xf32, #tpu.memory_space<vmem>>, vector<1x8x128xf32>
    %115 = vector.shape_cast %114 : vector<1x8x128xf32> to vector<8x128xf32>
    %116 = tpu.concatenate %113, %115 in 1 : vector<8x512xf32>, vector<8x128xf32> -> vector<8x640xf32>
    %c20 = arith.constant 20 : index
    %117 = memref.load %arg2[%c20] : memref<40xf32, #tpu.memory_space<smem>>
    %118 = vector.extract_strided_slice %116 {offsets = [0, 0], sizes = [8, 512], strides = [1, 1]} : vector<8x640xf32> to vector<8x512xf32>
    %119 = vector.broadcast %117 : f32 to vector<8x512xf32>
    %120 = arith.mulf %119, %118 : vector<8x512xf32>
    %121 = arith.addf %111, %120 : vector<8x512xf32>
    %c21 = arith.constant 21 : index
    %122 = memref.load %arg2[%c21] : memref<40xf32, #tpu.memory_space<smem>>
    %123 = vector.extract_strided_slice %116 {offsets = [0, 1], sizes = [8, 512], strides = [1, 1]} : vector<8x640xf32> to vector<8x512xf32>
    %124 = vector.broadcast %122 : f32 to vector<8x512xf32>
    %125 = arith.mulf %124, %123 : vector<8x512xf32>
    %126 = arith.addf %121, %125 : vector<8x512xf32>
    %c22 = arith.constant 22 : index
    %127 = memref.load %arg2[%c22] : memref<40xf32, #tpu.memory_space<smem>>
    %128 = vector.extract_strided_slice %116 {offsets = [0, 2], sizes = [8, 512], strides = [1, 1]} : vector<8x640xf32> to vector<8x512xf32>
    %129 = vector.broadcast %127 : f32 to vector<8x512xf32>
    %130 = arith.mulf %129, %128 : vector<8x512xf32>
    %131 = arith.addf %126, %130 : vector<8x512xf32>
    %c23 = arith.constant 23 : index
    %132 = memref.load %arg2[%c23] : memref<40xf32, #tpu.memory_space<smem>>
    %133 = vector.extract_strided_slice %116 {offsets = [0, 3], sizes = [8, 512], strides = [1, 1]} : vector<8x640xf32> to vector<8x512xf32>
    %134 = vector.broadcast %132 : f32 to vector<8x512xf32>
    %135 = arith.mulf %134, %133 : vector<8x512xf32>
    %136 = arith.addf %131, %135 : vector<8x512xf32>
    %c24 = arith.constant 24 : index
    %137 = memref.load %arg2[%c24] : memref<40xf32, #tpu.memory_space<smem>>
    %138 = vector.extract_strided_slice %116 {offsets = [0, 4], sizes = [8, 512], strides = [1, 1]} : vector<8x640xf32> to vector<8x512xf32>
    %139 = vector.broadcast %137 : f32 to vector<8x512xf32>
    %140 = arith.mulf %139, %138 : vector<8x512xf32>
    %141 = arith.addf %136, %140 : vector<8x512xf32>
    %c25 = arith.constant 25 : index
    %142 = memref.load %arg2[%c25] : memref<40xf32, #tpu.memory_space<smem>>
    %143 = vector.extract_strided_slice %116 {offsets = [0, 5], sizes = [8, 512], strides = [1, 1]} : vector<8x640xf32> to vector<8x512xf32>
    %144 = vector.broadcast %142 : f32 to vector<8x512xf32>
    %145 = arith.mulf %144, %143 : vector<8x512xf32>
    %146 = arith.addf %141, %145 : vector<8x512xf32>
    %c26 = arith.constant 26 : index
    %147 = memref.load %arg2[%c26] : memref<40xf32, #tpu.memory_space<smem>>
    %148 = vector.extract_strided_slice %116 {offsets = [0, 6], sizes = [8, 512], strides = [1, 1]} : vector<8x640xf32> to vector<8x512xf32>
    %149 = vector.broadcast %147 : f32 to vector<8x512xf32>
    %150 = arith.mulf %149, %148 : vector<8x512xf32>
    %151 = arith.addf %146, %150 : vector<8x512xf32>
    %c27 = arith.constant 27 : index
    %152 = memref.load %arg2[%c27] : memref<40xf32, #tpu.memory_space<smem>>
    %153 = vector.extract_strided_slice %116 {offsets = [0, 7], sizes = [8, 512], strides = [1, 1]} : vector<8x640xf32> to vector<8x512xf32>
    %154 = vector.broadcast %152 : f32 to vector<8x512xf32>
    %155 = arith.mulf %154, %153 : vector<8x512xf32>
    %156 = arith.addf %151, %155 : vector<8x512xf32>
    %c28 = arith.constant 28 : index
    %157 = memref.load %arg2[%c28] : memref<40xf32, #tpu.memory_space<smem>>
    %158 = vector.extract_strided_slice %116 {offsets = [0, 8], sizes = [8, 512], strides = [1, 1]} : vector<8x640xf32> to vector<8x512xf32>
    %159 = vector.broadcast %157 : f32 to vector<8x512xf32>
    %160 = arith.mulf %159, %158 : vector<8x512xf32>
    %161 = arith.addf %156, %160 : vector<8x512xf32>
    %c29 = arith.constant 29 : index
    %162 = memref.load %arg2[%c29] : memref<40xf32, #tpu.memory_space<smem>>
    %163 = vector.extract_strided_slice %116 {offsets = [0, 9], sizes = [8, 512], strides = [1, 1]} : vector<8x640xf32> to vector<8x512xf32>
    %164 = vector.broadcast %162 : f32 to vector<8x512xf32>
    %165 = arith.mulf %164, %163 : vector<8x512xf32>
    %166 = arith.addf %161, %165 : vector<8x512xf32>
    %c3_19 = arith.constant 3 : index
    %c0_20 = arith.constant 0 : index
    %c0_21 = arith.constant 0 : index
    %167 = vector.load %arg4[%c3_19, %c0_20, %c0_21] : memref<4x8x512xf32, #tpu.memory_space<vmem>>, vector<1x8x512xf32>
    %168 = vector.shape_cast %167 : vector<1x8x512xf32> to vector<8x512xf32>
    %c3_22 = arith.constant 3 : index
    %c0_23 = arith.constant 0 : index
    %c0_24 = arith.constant 0 : index
    %169 = vector.load %arg5[%c3_22, %c0_23, %c0_24] : memref<4x8x128xf32, #tpu.memory_space<vmem>>, vector<1x8x128xf32>
    %170 = vector.shape_cast %169 : vector<1x8x128xf32> to vector<8x128xf32>
    %171 = tpu.concatenate %168, %170 in 1 : vector<8x512xf32>, vector<8x128xf32> -> vector<8x640xf32>
    %c30 = arith.constant 30 : index
    %172 = memref.load %arg2[%c30] : memref<40xf32, #tpu.memory_space<smem>>
    %173 = vector.extract_strided_slice %171 {offsets = [0, 0], sizes = [8, 512], strides = [1, 1]} : vector<8x640xf32> to vector<8x512xf32>
    %174 = vector.broadcast %172 : f32 to vector<8x512xf32>
    %175 = arith.mulf %174, %173 : vector<8x512xf32>
    %176 = arith.addf %166, %175 : vector<8x512xf32>
    %c31 = arith.constant 31 : index
    %177 = memref.load %arg2[%c31] : memref<40xf32, #tpu.memory_space<smem>>
    %178 = vector.extract_strided_slice %171 {offsets = [0, 1], sizes = [8, 512], strides = [1, 1]} : vector<8x640xf32> to vector<8x512xf32>
    %179 = vector.broadcast %177 : f32 to vector<8x512xf32>
    %180 = arith.mulf %179, %178 : vector<8x512xf32>
    %181 = arith.addf %176, %180 : vector<8x512xf32>
    %c32 = arith.constant 32 : index
    %182 = memref.load %arg2[%c32] : memref<40xf32, #tpu.memory_space<smem>>
    %183 = vector.extract_strided_slice %171 {offsets = [0, 2], sizes = [8, 512], strides = [1, 1]} : vector<8x640xf32> to vector<8x512xf32>
    %184 = vector.broadcast %182 : f32 to vector<8x512xf32>
    %185 = arith.mulf %184, %183 : vector<8x512xf32>
    %186 = arith.addf %181, %185 : vector<8x512xf32>
    %c33 = arith.constant 33 : index
    %187 = memref.load %arg2[%c33] : memref<40xf32, #tpu.memory_space<smem>>
    %188 = vector.extract_strided_slice %171 {offsets = [0, 3], sizes = [8, 512], strides = [1, 1]} : vector<8x640xf32> to vector<8x512xf32>
    %189 = vector.broadcast %187 : f32 to vector<8x512xf32>
    %190 = arith.mulf %189, %188 : vector<8x512xf32>
    %191 = arith.addf %186, %190 : vector<8x512xf32>
    %c34 = arith.constant 34 : index
    %192 = memref.load %arg2[%c34] : memref<40xf32, #tpu.memory_space<smem>>
    %193 = vector.extract_strided_slice %171 {offsets = [0, 4], sizes = [8, 512], strides = [1, 1]} : vector<8x640xf32> to vector<8x512xf32>
    %194 = vector.broadcast %192 : f32 to vector<8x512xf32>
    %195 = arith.mulf %194, %193 : vector<8x512xf32>
    %196 = arith.addf %191, %195 : vector<8x512xf32>
    %c35 = arith.constant 35 : index
    %197 = memref.load %arg2[%c35] : memref<40xf32, #tpu.memory_space<smem>>
    %198 = vector.extract_strided_slice %171 {offsets = [0, 5], sizes = [8, 512], strides = [1, 1]} : vector<8x640xf32> to vector<8x512xf32>
    %199 = vector.broadcast %197 : f32 to vector<8x512xf32>
    %200 = arith.mulf %199, %198 : vector<8x512xf32>
    %201 = arith.addf %196, %200 : vector<8x512xf32>
    %c36 = arith.constant 36 : index
    %202 = memref.load %arg2[%c36] : memref<40xf32, #tpu.memory_space<smem>>
    %203 = vector.extract_strided_slice %171 {offsets = [0, 6], sizes = [8, 512], strides = [1, 1]} : vector<8x640xf32> to vector<8x512xf32>
    %204 = vector.broadcast %202 : f32 to vector<8x512xf32>
    %205 = arith.mulf %204, %203 : vector<8x512xf32>
    %206 = arith.addf %201, %205 : vector<8x512xf32>
    %c37 = arith.constant 37 : index
    %207 = memref.load %arg2[%c37] : memref<40xf32, #tpu.memory_space<smem>>
    %208 = vector.extract_strided_slice %171 {offsets = [0, 7], sizes = [8, 512], strides = [1, 1]} : vector<8x640xf32> to vector<8x512xf32>
    %209 = vector.broadcast %207 : f32 to vector<8x512xf32>
    %210 = arith.mulf %209, %208 : vector<8x512xf32>
    %211 = arith.addf %206, %210 : vector<8x512xf32>
    %c38 = arith.constant 38 : index
    %212 = memref.load %arg2[%c38] : memref<40xf32, #tpu.memory_space<smem>>
    %213 = vector.extract_strided_slice %171 {offsets = [0, 8], sizes = [8, 512], strides = [1, 1]} : vector<8x640xf32> to vector<8x512xf32>
    %214 = vector.broadcast %212 : f32 to vector<8x512xf32>
    %215 = arith.mulf %214, %213 : vector<8x512xf32>
    %216 = arith.addf %211, %215 : vector<8x512xf32>
    %c39 = arith.constant 39 : index
    %217 = memref.load %arg2[%c39] : memref<40xf32, #tpu.memory_space<smem>>
    %218 = vector.extract_strided_slice %171 {offsets = [0, 9], sizes = [8, 512], strides = [1, 1]} : vector<8x640xf32> to vector<8x512xf32>
    %219 = vector.broadcast %217 : f32 to vector<8x512xf32>
    %220 = arith.mulf %219, %218 : vector<8x512xf32>
    %221 = arith.addf %216, %220 : vector<8x512xf32>
    %cst = arith.constant 0.000000e+00 : f32
    %222 = vector.broadcast %cst : f32 to vector<8x512xf32>
    %223 = arith.maximumf %221, %222 : vector<8x512xf32>
    %c0_25 = arith.constant 0 : index
    %c0_26 = arith.constant 0 : index
    %224 = vector.load %arg6[%c0_25, %c0_26] : memref<8x512xf32, #tpu.memory_space<vmem>>, vector<8x512xf32>
    tpu.vector_store %arg6[%c0_25, %c0_26], %223 {strides = array<i32>} : memref<8x512xf32, #tpu.memory_space<vmem>>, vector<8x512xf32>,
    return
  }
  func.func @transform_0(%arg0: i32, %arg1: i32) -> i32 {
    %c0_i32 = arith.constant 0 : i32
    %c0_i32_0 = arith.constant 0 : i32
    return %c0_i32 : i32
  }
  func.func @transform_1(%arg0: i32, %arg1: i32) -> i32 {
    %c0_i32 = arith.constant 0 : i32
    %c0_i32_0 = arith.constant 0 : i32
    return %c0_i32 : i32
  }
  func.func @transform_2(%arg0: i32, %arg1: i32) -> (i32, i32, i32) {
    %c0_i32 = arith.constant 0 : i32
    %c0_i32_0 = arith.constant 0 : i32
    return %c0_i32, %arg0, %arg1 : i32, i32, i32
  }
  func.func @transform_3(%arg0: i32, %arg1: i32) -> (i32, i32, i32) {
    %c1_i32 = arith.constant 1 : i32
    %0 = arith.addi %arg1, %c1_i32 : i32
    %c4_i32 = arith.constant 4 : i32
    %1 = arith.muli %0, %c4_i32 : i32
    %c0_i32 = arith.constant 0 : i32
    %c0_i32_0 = arith.constant 0 : i32
    return %c0_i32, %arg0, %1 : i32, i32, i32
  }
  func.func @transform_4(%arg0: i32, %arg1: i32) -> (i32, i32) {
    %c0_i32 = arith.constant 0 : i32
    return %arg0, %arg1 : i32, i32
  }
}

</mosaic_0001>

<bundles_post_ra>
// kernel: _lambda_.1
= control target key start
LH: loop header
LB: loop body
LE: loop exit
PB: predicated region body
PF: predicated region fallthrough
CT: control target
= control target key end

     0   :  { %10 = vsyncpa [#allocation4], 0  ;;  %s2562_s0 = inlined_call_operand.vmem [shape: f32[40], index: 0, kind: input, shape index: {}]   ;;  %s2563_s1 = inlined_call_operand.<no memory space> [shape: f32[1], index: 1, kind: input, shape index: {}]   ;;  %s2564_s2 = inlined_call_operand.vmem [shape: f32[4,8,640], index: 2, kind: input, shape index: {}, may-alias: {2,3}]   ;;  %s2565_s3 = inlined_call_operand.vmem [shape: f32[4,8,640], index: 3, kind: input, shape index: {}, may-alias: {2,3}]   ;;  %s2566_s4 = inlined_call_operand.vmem [shape: f32[8,512], index: 4, kind: output, shape index: {}]  }
   0x1   :  { %s17_s17 = sshll.u32 %s2562_s0, 4  ;;  %v1563_v0 = vld [vmem:[%s2564_s2] sm:$0xff]  ;;  %v1568_v1 = vld [vmem:[%s2564_s2 + $0x8] sm:$0xff]  ;;  %v1573_v2 = vld [vmem:[%s2564_s2 + $0x10] sm:$0xff]  ;;  %s18_s17 = int_to_ptr.vmem [resolvable:$true] %s17_s17 }
   0x2   :  { %v1578_v3 = vld [vmem:[%s2564_s2 + $0x18] sm:$0xff]  ;;  %v1583_v4 = vld [vmem:[%s2564_s2 + $0x28] sm:$0xff]  ;;  %s1508_s27 = scalar_lea.vmem %s18_s17, 16  ;;  %p1513_p1 = scmp.lt.s32.totalorder %s18_s17, %s18_s17 }
   0x3   :  { %p1509_p0 = scmp.ne.s32.totalorder %s18_s17, %s1508_s27  ;;  %p1514_p2 = scmp.lt.s32.totalorder %s1508_s27, %s1508_s27 }
   0x5   :  { %p1515_p3 = por %p1514_p2, %p1513_p1 }
   0x7   :  { %p1516_p4 = pnand %p1515_p3, %p1509_p0 }
   0x9   :  { %1519 = shalt.err (!%p1516_p4)
}
   0xa   :  { %s1522_s28 = smov [#allocation3]   ;;  %v1588_v5 = vld [vmem:[%s2564_s2 + $0x30] sm:$0xff]  ;;  %v1593_v6 = vld [vmem:[%s2564_s2 + $0x38] sm:$0xff]  ;;  %v1598_v7 = vld [vmem:[%s2564_s2 + $0x40] sm:$0xff] }
   0xb   :  { %20 = dma.vmem_to_smem %s18_s17, 16, %s1522_s28, [#allocation4]   ;;  %2588 = vst [vmem:[#allocation8_spill] sm:$0xff] %v1598_v7  ;;  %v1603_v8 = vld [vmem:[%s2564_s2 + $0x50] sm:$0xff]  ;;  %v1608_v9 = vld [vmem:[%s2564_s2 + $0x58] sm:$0xff]  ;;  %v1613_v10 = vld [vmem:[%s2564_s2 + $0x60] sm:$0xff] }
   0xc   :  { %v1618_v11 = vld [vmem:[%s2564_s2 + $0x68] sm:$0xff]  ;;  %v1623_v12 = vld [vmem:[%s2564_s2 + $0x78] sm:$0xff]  ;;  %v1628_v13 = vld [vmem:[%s2564_s2 + $0x80] sm:$0xff] }
   0xd   :  { %2589 = vst [vmem:[#allocation9_spill] sm:$0xff] %v1628_v13  ;;  %v1633_v14 = vld [vmem:[%s2564_s2 + $0x88] sm:$0xff]  ;;  %v1638_v15 = vld [vmem:[%s2564_s2 + $0x90] sm:$0xff]  ;;  %v1643_v16 = vld [vmem:[%s2565_s3 + $0x20] sm:$0xff] }
   0xe   :  { %2590 = vst [vmem:[#allocation10_spill] sm:$0xff] %v1633_v14  ;;  %2591 = vst [vmem:[#allocation11_spill] sm:$0xff] %v1638_v15  ;;  %v1648_v17 = vld [vmem:[%s2565_s3 + $0x48] sm:$0xff]  ;;  %v1653_v18 = vld [vmem:[%s2565_s3 + $0x70] sm:$0xff] }
   0xf   :  { %v1658_v19 = vld [vmem:[%s2565_s3 + $0x98] sm:$0xff] }
  0x10   :  { %2592 = vst [vmem:[#allocation12_spill] sm:$0xff] %v1658_v19 }
  0x11   :  { %1520 = dma.done.wait [#allocation4], 16  }
  0x12   :  { %1521 = vsyncadd [#allocation4], 4294967280 }
  0x13   :  { %129 = sfence }
  0x14   :  { %s1459_s2 = sld [smem:[#allocation3 + $0x1]]  ;;  %s1460_s6 = sld [smem:[#allocation3 + $0x2]]  ;;  %vm171_vm0 = vcmask 1039360   ;;  %vm206_vm1 = vcmask 1031168   ;;  %vm241_vm2 = vcmask 1022976   ;;  %vm276_vm3 = vcmask 1014784  }
  0x15   :  { %s1523_s7 = smov 127   ;;  %s1461_s3 = sld [smem:[#allocation3 + $0x3]]  ;;  %vm311_vm4 = vcmask 1006592   ;;  %vm346_vm5 = vcmask 998400   ;;  %vm381_vm6 = vcmask 990208   ;;  %vm416_vm7 = vcmask 982016  }
  0x16   :  { %s1524_s8 = smov 126   ;;  %s1462_s9 = sld [smem:[#allocation3 + $0x4]]  ;;  %vm451_vm8 = vcmask 973824  }
  0x17   :  { %s1525_s10 = smov 125   ;;  %s1463_s11 = sld [smem:[#allocation3 + $0x5]] }
  0x18   :  { %s1526_s12 = smov 124   ;;  %s1464_s13 = sld [smem:[#allocation3 + $0x6]] }
  0x19   :  { %s1527_s14 = smov 123   ;;  %s1465_s15 = sld [smem:[#allocation3 + $0x7]] }
  0x1a   :  { %v150_v20 = vstv %s1459_s2  ;;  %v185_v25 = vstv %s1460_s6  ;;  %s1528_s16 = smov 122   ;;  %s1466_s17 = sld [smem:[#allocation3 + $0x8]] }
  0x1b   :  { %v153_v21 = vmul.f32 %v150_v20, %v1573_v2  ;;  %v151_v22 = vmul.f32 %v150_v20, %v1563_v0  ;;  %v154_v23 = vmul.f32 %v150_v20, %v1578_v3  ;;  %v152_v24 = vmul.f32 %v150_v20, %v1568_v1  ;;  %s1529_s18 = smov 121   ;;  %s1467_s19 = sld [smem:[#allocation3 + $0x9]] }
  0x1c   :  { %v186_v26 = vmul.f32 %v185_v25, %v1563_v0  ;;  %v155_v27 = vmul.f32 %v1643_v16, %v150_v20  ;;  %v188_v28 = vmul.f32 %v185_v25, %v1573_v2  ;;  %v187_v29 = vmul.f32 %v185_v25, %v1568_v1  ;;  %s1530_s20 = smov 120   ;;  %s1469_s21 = sld [smem:[#allocation3 + $0xb]] }
  0x1d   :  { %165 = vrot.lane.b32.xlu1 %v153_v21, %s1523_s7  ;;  %161 = vrot.lane.b32.xlu0 %v151_v22, %s1523_s7  ;;  %v190_v30 = vmul.f32 %v1643_v16, %v185_v25  ;;  %v189_v31 = vmul.f32 %v185_v25, %v1578_v3  ;;  %v220_v32 = vstv %s1461_s3  ;;  %v255_v37 = vstv %s1462_s9  ;;  %s1531_s22 = smov 119   ;;  %s1470_s23 = sld [smem:[#allocation3 + $0xc]] }
  0x1e   :  { %v222_v33 = vmul.f32 %v220_v32, %v1568_v1  ;;  %v221_v34 = vmul.f32 %v220_v32, %v1563_v0  ;;  %v224_v35 = vmul.f32 %v220_v32, %v1578_v3  ;;  %v223_v36 = vmul.f32 %v220_v32, %v1573_v2  ;;  %s1471_s24 = sld [smem:[#allocation3 + $0xd]]  ;;  %s1472_s25 = sld [smem:[#allocation3 + $0xe]] }
  0x1f   :  { %v256_v38 = vmul.f32 %v255_v37, %v1563_v0  ;;  %v225_v39 = vmul.f32 %v1643_v16, %v220_v32  ;;  %v258_v40 = vmul.f32 %v255_v37, %v1573_v2  ;;  %v257_v41 = vmul.f32 %v255_v37, %v1568_v1  ;;  %s1473_s0 = sld [smem:[#allocation3 + $0xf]]  ;;  %s1474_s26 = sld [smem:[#allocation3 + $0x10]] }
  0x20   :  { %v260_v42 = vmul.f32 %v1643_v16, %v255_v37  ;;  %v259_v43 = vmul.f32 %v255_v37, %v1578_v3  ;;  %v290_v44 = vstv %s1463_s11  ;;  %v325_v49 = vstv %s1464_s13  ;;  %s1475_s27 = sld [smem:[#allocation3 + $0x11]]  ;;  %s1476_s28 = sld [smem:[#allocation3 + $0x12]] }
  0x21   :  { %167 = vrot.lane.b32.xlu1 %v154_v23, %s1523_s7  ;;  %163 = vrot.lane.b32.xlu0 %v152_v24, %s1523_s7  ;;  %v292_v45 = vmul.f32 %v290_v44, %v1568_v1  ;;  %v291_v46 = vmul.f32 %v290_v44, %v1563_v0  ;;  %v294_v47 = vmul.f32 %v290_v44, %v1578_v3  ;;  %v360_v56 = vstv %s1465_s15  ;;  %s1477_s29 = sld [smem:[#allocation3 + $0x13]]  ;;  %s1479_s30 = sld [smem:[#allocation3 + $0x15]] }
  0x22   :  { %v293_v48 = vmul.f32 %v290_v44, %v1573_v2  ;;  %v326_v50 = vmul.f32 %v325_v49, %v1563_v0  ;;  %v295_v51 = vmul.f32 %v1643_v16, %v290_v44  ;;  %v328_v52 = vmul.f32 %v325_v49, %v1573_v2  ;;  %s1480_s5 = sld [smem:[#allocation3 + $0x16]]  ;;  %s1481_s2 = sld [smem:[#allocation3 + $0x17]] }
  0x23   :  { %v327_v53 = vmul.f32 %v325_v49, %v1568_v1  ;;  %v330_v54 = vmul.f32 %v1643_v16, %v325_v49  ;;  %v329_v55 = vmul.f32 %v325_v49, %v1578_v3  ;;  %v362_v57 = vmul.f32 %v360_v56, %v1568_v1  ;;  %s1482_s6 = sld [smem:[#allocation3 + $0x18]]  ;;  %s1483_s3 = sld [smem:[#allocation3 + $0x19]] }
  0x24   :  { %v361_v58 = vmul.f32 %v360_v56, %v1563_v0  ;;  %v364_v59 = vmul.f32 %v360_v56, %v1578_v3  ;;  %v363_v60 = vmul.f32 %v360_v56, %v1573_v2  ;;  %v395_v61 = vstv %s1466_s17  ;;  %s1484_s9 = sld [smem:[#allocation3 + $0x1a]]  ;;  %s139_s11 = sld [smem:[#allocation3]] }
  0x25   :  { %196 = vrot.lane.b32.xlu1 %v186_v26, %s1524_s8  ;;  %169 = vrot.lane.b32.xlu0 %v155_v27, %s1523_s7  ;;  %v396_v62 = vmul.f32 %v395_v61, %v1563_v0  ;;  %v365_v63 = vmul.f32 %v1643_v16, %v360_v56  ;;  %v398_v20 = vmul.f32 %v395_v61, %v1573_v2  ;;  %v430_v24 = vstv %s1467_s19  ;;  %s1485_s13 = sld [smem:[#allocation3 + $0x1b]]  ;;  %s1468_s15 = sld [smem:[#allocation3 + $0xa]] }
  0x26   :  { %v397_v21 = vmul.f32 %v395_v61, %v1568_v1  ;;  %v400_v22 = vmul.f32 %v1643_v16, %v395_v61  ;;  %v399_v23 = vmul.f32 %v395_v61, %v1578_v3  ;;  %v432_v25 = vmul.f32 %v430_v24, %v1568_v1  ;;  %s1486_s17 = sld [smem:[#allocation3 + $0x1c]] }
  0x27   :  { %v431_v26 = vmul.f32 %v430_v24, %v1563_v0  ;;  %v434_v27 = vmul.f32 %v430_v24, %v1578_v3  ;;  %v618_v56 = vstv %s1473_s0  ;;  %s2337_s0 = sld [smem:[#allocation3 + $0x14]] }
  0x28   :  { %v873_v19 = vstv %s1481_s2 }
  0x29   :  { %200 = vrot.lane.b32.xlu1 %v188_v28, %s1524_s8  ;;  %198 = vrot.lane.b32.xlu0 %v187_v29, %s1524_s8  ;;  %v433_v28 = vmul.f32 %v430_v24, %v1573_v2  ;;  %v482_v29 = vstv %s1469_s21  ;;  %v875_v13 = vmul.f32 %v873_v19, %v1608_v9 }
  0x2a   :  { %v485_v32 = vmul.f32 %v482_v29, %v1593_v6 }
  0x2d   :  { %204 = vrot.lane.b32.xlu1 %v190_v30, %s1524_s8  ;;  %202 = vrot.lane.b32.xlu0 %v189_v31, %s1524_s8  ;;  %v483_v30 = vmul.f32 %v482_v29, %v1583_v4  ;;  %v435_v31 = vmul.f32 %v1643_v16, %v430_v24  ;;  %v622_v24 = vmul.f32 %v618_v56, %v1598_v7 }
  0x31   :  { %233 = vrot.lane.b32.xlu1 %v222_v33, %s1525_s10  ;;  %231 = vrot.lane.b32.xlu0 %v221_v34, %s1525_s10  ;;  %v484_v33 = vmul.f32 %v482_v29, %v1588_v5  ;;  %v487_v34 = vmul.f32 %v1648_v17, %v482_v29 }
  0x35   :  { %237 = vrot.lane.b32.xlu1 %v224_v35, %s1525_s10  ;;  %235 = vrot.lane.b32.xlu0 %v223_v36, %s1525_s10  ;;  %v486_v35 = vmul.f32 %v482_v29, %v1598_v7  ;;  %v516_v36 = vstv %s1470_s23  ;;  %s2037_s23 = sld [smem:[#allocation3 + $0x1d]] }
  0x36   :  { %v518_v16 = vmul.f32 %v516_v36, %v1588_v5  ;;  %v517_v37 = vmul.f32 %v516_v36, %v1583_v4 }
  0x39   :  { %266 = vrot.lane.b32.xlu1 %v256_v38, %s1526_s12  ;;  %239 = vrot.lane.b32.xlu0 %v225_v39, %s1525_s10  ;;  %v520_v38 = vmul.f32 %v516_v36, %v1598_v7  ;;  %v519_v39 = vmul.f32 %v516_v36, %v1593_v6 }
  0x3d   :  { %270 = vrot.lane.b32.xlu1 %v258_v40, %s1526_s12  ;;  %268 = vrot.lane.b32.xlu0 %v257_v41, %s1526_s12  ;;  %v550_v40 = vstv %s1471_s24  ;;  %s2181_s24 = sld [smem:[#allocation3 + $0x20]] }
  0x3e   :  { %v551_v41 = vmul.f32 %v550_v40, %v1583_v4  ;;  %v552_v44 = vmul.f32 %v550_v40, %v1588_v5 }
  0x41   :  { %274 = vrot.lane.b32.xlu1 %v260_v42, %s1526_s12  ;;  %272 = vrot.lane.b32.xlu0 %v259_v43, %s1526_s12  ;;  %v521_v42 = vmul.f32 %v1648_v17, %v516_v36  ;;  %v553_v43 = vmul.f32 %v550_v40, %v1593_v6 }
  0x45   :  { %303 = vrot.lane.b32.xlu1 %v292_v45, %s1527_s14  ;;  %301 = vrot.lane.b32.xlu0 %v291_v46, %s1527_s14  ;;  %v555_v45 = vmul.f32 %v1648_v17, %v550_v40  ;;  %v554_v46 = vmul.f32 %v550_v40, %v1598_v7 }
  0x49   :  { %307 = vrot.lane.b32.xlu1 %v294_v47, %s1527_s14  ;;  %305 = vrot.lane.b32.xlu0 %v293_v48, %s1527_s14  ;;  %v584_v47 = vstv %s1472_s25  ;;  %s2190_s25 = sld [smem:[#allocation3 + $0x21]] }
  0x4d   :  { %336 = vrot.lane.b32.xlu1 %v326_v50, %s1528_s16  ;;  %309 = vrot.lane.b32.xlu0 %v295_v51, %s1527_s14  ;;  %v586_v50 = vmul.f32 %v584_v47, %v1588_v5  ;;  %v585_v51 = vmul.f32 %v584_v47, %v1583_v4 }
  0x51   :  { %340 = vrot.lane.b32.xlu1 %v328_v52, %s1528_s16  ;;  %338 = vrot.lane.b32.xlu0 %v327_v53, %s1528_s16 }
  0x55   :  { %344 = vrot.lane.b32.xlu1 %v330_v54, %s1528_s16  ;;  %342 = vrot.lane.b32.xlu0 %v329_v55, %s1528_s16  ;;  %v588_v54 = vmul.f32 %v584_v47, %v1598_v7  ;;  %v587_v55 = vmul.f32 %v584_v47, %v1593_v6 }
  0x59   :  { %373 = vrot.lane.b32.xlu1 %v362_v57, %s1529_s18  ;;  %371 = vrot.lane.b32.xlu0 %v361_v58, %s1529_s18 }
  0x5d   :  { %377 = vrot.lane.b32.xlu1 %v364_v59, %s1529_s18  ;;  %375 = vrot.lane.b32.xlu0 %v363_v60, %s1529_s18  ;;  %v619_v59 = vmul.f32 %v618_v56, %v1583_v4  ;;  %v589_v60 = vmul.f32 %v1648_v17, %v584_v47 }
  0x61   :  { %406 = vrot.lane.b32.xlu1 %v396_v62, %s1530_s20  ;;  %379 = vrot.lane.b32.xlu0 %v365_v63, %s1529_s18  ;;  %v621_v63 = vmul.f32 %v618_v56, %v1593_v6 }
  0x65   :  { %410 = vrot.lane.b32.xlu1 %v398_v20, %s1530_s20  ;;  %408 = vrot.lane.b32.xlu0 %v397_v21, %s1530_s20  ;;  %v620_v20 = vmul.f32 %v618_v56, %v1588_v5 }
  0x69   :  { %414 = vrot.lane.b32.xlu1 %v400_v22, %s1530_s20  ;;  %412 = vrot.lane.b32.xlu0 %v399_v23, %s1530_s20  ;;  %v623_v23 = vmul.f32 %v1648_v17, %v618_v56 }
  0x6d   :  { %443 = vrot.lane.b32.xlu1 %v432_v25, %s1531_s22  ;;  %441 = vrot.lane.b32.xlu0 %v431_v26, %s1531_s22  ;;  %v652_v25 = vstv %s1474_s26 }
  0x6e   :  { %v653_v29 = vmul.f32 %v652_v25, %v1583_v4 }
  0x71   :  { %447 = vrot.lane.b32.xlu1 %v434_v27, %s1531_s22  ;;  %445 = vrot.lane.b32.xlu0 %v433_v28, %s1531_s22  ;;  %v654_v28 = vmul.f32 %v652_v25, %v1588_v5 }
  0x75   :  { %493 = vrot.lane.b32.xlu1 %v483_v30, %s1523_s7  ;;  %449 = vrot.lane.b32.xlu0 %v435_v31, %s1531_s22 }
  0x79   :  { %497 = vrot.lane.b32.xlu1 %v485_v32, %s1523_s7  ;;  %495 = vrot.lane.b32.xlu0 %v484_v33, %s1523_s7  ;;  %v656_v32 = vmul.f32 %v652_v25, %v1598_v7  ;;  %v655_v33 = vmul.f32 %v652_v25, %v1593_v6 }
  0x7d   :  { %501 = vrot.lane.b32.xlu1 %v487_v34, %s1523_s7  ;;  %499 = vrot.lane.b32.xlu0 %v486_v35, %s1523_s7  ;;  %v686_v34 = vstv %s1475_s27 }
  0x7e   :  { %v689_v40 = vmul.f32 %v686_v34, %v1593_v6 }
  0x81   :  { %529 = vrot.lane.b32.xlu1 %v518_v16, %s1524_s8  ;;  %527 = vrot.lane.b32.xlu0 %v517_v37, %s1524_s8  ;;  %v687_v16 = vmul.f32 %v686_v34, %v1583_v4  ;;  %v657_v37 = vmul.f32 %v1648_v17, %v652_v25 }
  0x85   :  { %533 = vrot.lane.b32.xlu1 %v520_v38, %s1524_s8  ;;  %531 = vrot.lane.b32.xlu0 %v519_v39, %s1524_s8 }
  0x89   :  { %561 = vrot.lane.b32.xlu1 %v551_v41, %s1525_s10  ;;  %535 = vrot.lane.b32.xlu0 %v521_v42, %s1524_s8  ;;  %v688_v41 = vmul.f32 %v686_v34, %v1588_v5 }
  0x8d   :  { %565 = vrot.lane.b32.xlu1 %v553_v43, %s1525_s10  ;;  %563 = vrot.lane.b32.xlu0 %v552_v44, %s1525_s10  ;;  %v691_v44 = vmul.f32 %v1648_v17, %v686_v34 }
  0x8f   :  { %v1778_v48 = vpop.permute.xlu1 %165  ;;  %v1780_v49 = vpop.permute.xlu0 %161 }
  0x91   :  { %569 = vrot.lane.b32.xlu1 %v555_v45, %s1525_s10  ;;  %567 = vrot.lane.b32.xlu0 %v554_v46, %s1525_s10  ;;  %v690_v45 = vmul.f32 %v686_v34, %v1598_v7  ;;  %v720_v46 = vstv %s1476_s28 }
  0x92   :  { %v725_v25 = vmul.f32 %v1648_v17, %v720_v46 }
  0x93   :  { %v1786_v52 = vpop.permute.xlu1 %167  ;;  %v1788_v53 = vpop.permute.xlu0 %163 }
  0x95   :  { %597 = vrot.lane.b32.xlu1 %v586_v50, %s1526_s12  ;;  %595 = vrot.lane.b32.xlu0 %v585_v51, %s1526_s12  ;;  %v722_v51 = vmul.f32 %v720_v46, %v1588_v5 }
  0x97   :  { %v1794_v57 = vpop.permute.xlu1 %196  ;;  %v1796_v58 = vpop.permute.xlu0 %169 }
  0x99   :  { %601 = vrot.lane.b32.xlu1 %v588_v54, %s1526_s12  ;;  %599 = vrot.lane.b32.xlu0 %v587_v55, %s1526_s12  ;;  %v721_v54 = vmul.f32 %v720_v46, %v1583_v4 }
  0x9b   :  { %v1802_v61 = vpop.permute.xlu1 %200  ;;  %v1804_v62 = vpop.permute.xlu0 %198 }
  0x9d   :  { %629 = vrot.lane.b32.xlu1 %v619_v59, %s1527_s14  ;;  %603 = vrot.lane.b32.xlu0 %v589_v60, %s1526_s12  ;;  %v724_v59 = vmul.f32 %v720_v46, %v1598_v7  ;;  %v723_v60 = vmul.f32 %v720_v46, %v1593_v6 }
  0x9f   :  { %v1810_v21 = vpop.permute.xlu1 %204  ;;  %v1812_v22 = vpop.permute.xlu0 %202 }
  0xa1   :  { %633 = vrot.lane.b32.xlu1 %v621_v63, %s1527_s14  ;;  %631 = vrot.lane.b32.xlu0 %v620_v20, %s1527_s14  ;;  %v754_v63 = vstv %s1477_s29 }
  0xa3   :  { %v1818_v26 = vpop.permute.xlu1 %233  ;;  %v1820_v27 = vpop.permute.xlu0 %231 }
  0xa5   :  { %637 = vrot.lane.b32.xlu1 %v623_v23, %s1527_s14  ;;  %635 = vrot.lane.b32.xlu0 %v622_v24, %s1527_s14  ;;  %v755_v24 = vmul.f32 %v754_v63, %v1583_v4 }
  0xa7   :  { %v1826_v30 = vpop.permute.xlu1 %237  ;;  %v1828_v31 = vpop.permute.xlu0 %235 }
  0xa9   :  { %665 = vrot.lane.b32.xlu1 %v654_v28, %s1528_s16  ;;  %663 = vrot.lane.b32.xlu0 %v653_v29, %s1528_s16 }
  0xab   :  { %v1834_v35 = vpop.permute.xlu1 %266  ;;  %v1836_v36 = vpop.permute.xlu0 %239 }
  0xad   :  { %669 = vrot.lane.b32.xlu1 %v656_v32, %s1528_s16  ;;  %667 = vrot.lane.b32.xlu0 %v655_v33, %s1528_s16  ;;  %v757_v32 = vmul.f32 %v754_v63, %v1593_v6  ;;  %v756_v33 = vmul.f32 %v754_v63, %v1588_v5 }
  0xaf   :  { %v1842_v38 = vpop.permute.xlu1 %270  ;;  %v1844_v39 = vpop.permute.xlu0 %268 }
  0xb1   :  { %697 = vrot.lane.b32.xlu1 %v687_v16, %s1529_s18  ;;  %671 = vrot.lane.b32.xlu0 %v657_v37, %s1528_s16  ;;  %v759_v37 = vmul.f32 %v1648_v17, %v754_v63 }
  0xb3   :  { %v1850_v42 = vpop.permute.xlu1 %274  ;;  %v1852_v43 = vpop.permute.xlu0 %272 }
  0xb5   :  { %701 = vrot.lane.b32.xlu1 %v689_v40, %s1529_s18  ;;  %699 = vrot.lane.b32.xlu0 %v688_v41, %s1529_s18  ;;  %v758_v40 = vmul.f32 %v754_v63, %v1598_v7  ;;  %v805_v41 = vstv %s1479_s30  ;;  %v839_v63 = vstv %s1480_s5  ;;  %v876_v7 = vmul.f32 %v873_v19, %v1613_v10 }
  0xb6   :  { %v807_v46 = vmul.f32 %v805_v41, %v1608_v9  ;;  %v809_v17 = vmul.f32 %v805_v41, %v1618_v11  ;;  %v843_v15 = vmul.f32 %v839_v63, %v1618_v11 }
  0xb7   :  { %v1858_v47 = vpop.permute.xlu1 %303  ;;  %v1860_v50 = vpop.permute.xlu0 %301 }
  0xb9   :  { %705 = vrot.lane.b32.xlu1 %v691_v44, %s1529_s18  ;;  %703 = vrot.lane.b32.xlu0 %v690_v45, %s1529_s18 }
  0xbb   :  { %v1866_v55 = vpop.permute.xlu1 %307  ;;  %v1868_v56 = vpop.permute.xlu0 %305 }
  0xbd   :  { %733 = vrot.lane.b32.xlu1 %v722_v51, %s1530_s20  ;;  %731 = vrot.lane.b32.xlu0 %v721_v54, %s1530_s20  ;;  %v806_v51 = vmul.f32 %v805_v41, %v1603_v8 }
  0xbf   :  { %v1874_v20 = vpop.permute.xlu1 %336  ;;  %v1876_v23 = vpop.permute.xlu0 %309 }
  0xc1   :  { %737 = vrot.lane.b32.xlu1 %v724_v59, %s1530_s20  ;;  %735 = vrot.lane.b32.xlu0 %v723_v60, %s1530_s20  ;;  %v808_v60 = vmul.f32 %v805_v41, %v1613_v10 }
  0xc3   :  { %v1882_v28 = vpop.permute.xlu1 %340  ;;  %v1884_v29 = vpop.permute.xlu0 %338 }
  0xc5   :  { %765 = vrot.lane.b32.xlu1 %v755_v24, %s1531_s22  ;;  %739 = vrot.lane.b32.xlu0 %v725_v25, %s1530_s20 }
  0xc7   :  { %v1890_v34 = vpop.permute.xlu1 %344  ;;  %v1892_v16 = vpop.permute.xlu0 %342 }
  0xc9   :  { %769 = vrot.lane.b32.xlu1 %v757_v32, %s1531_s22  ;;  %767 = vrot.lane.b32.xlu0 %v756_v33, %s1531_s22  ;;  %v840_v32 = vmul.f32 %v839_v63, %v1603_v8  ;;  %v810_v33 = vmul.f32 %v1653_v18, %v805_v41  ;;  %v844_v41 = vmul.f32 %v1653_v18, %v839_v63 }
  0xcb   :  { %v1898_v44 = vpop.permute.xlu1 %373  ;;  %v1900_v45 = vpop.permute.xlu0 %371 }
  0xcd   :  { %773 = vrot.lane.b32.xlu1 %v759_v37, %s1531_s22  ;;  %771 = vrot.lane.b32.xlu0 %v758_v40, %s1531_s22 }
  0xcf   :  { %v1906_v54 = vpop.permute.xlu1 %377  ;;  %v1908_v59 = vpop.permute.xlu0 %375 }
  0xd1   :  { %818 = vrot.lane.b32.xlu1 %v807_v46, %s1523_s7  ;;  %816 = vrot.lane.b32.xlu0 %v806_v51, %s1523_s7  ;;  %v842_v46 = vmul.f32 %v839_v63, %v1613_v10  ;;  %v841_v51 = vmul.f32 %v839_v63, %v1608_v9  ;;  %v877_v63 = vmul.f32 %v873_v19, %v1618_v11 }
  0xd3   :  { %v1914_v24 = vpop.permute.xlu1 %406  ;;  %v1916_v25 = vpop.permute.xlu0 %379 }
  0xd5   :  { %822 = vrot.lane.b32.xlu1 %v809_v17, %s1523_s7  ;;  %820 = vrot.lane.b32.xlu0 %v808_v60, %s1523_s7 }
  0xd7   :  { %v1922_v37 = vpop.permute.xlu1 %410  ;;  %v1924_v40 = vpop.permute.xlu0 %408 }
  0xd9   :  { %850 = vrot.lane.b32.xlu1 %v840_v32, %s1524_s8  ;;  %824 = vrot.lane.b32.xlu0 %v810_v33, %s1523_s7 }
  0xdb   :  { %v1930_v17 = vpop.permute.xlu1 %414  ;;  %v1932_v60 = vpop.permute.xlu0 %412 }
  0xdc   :  { %2593 = vst [vmem:[#allocation13_spill] sm:$0xff] %v1930_v17  ;;  %2594 = vst [vmem:[#allocation14_spill] sm:$0xff] %v1932_v60  ;;  %v1043_v60 = vstv %s1486_s17 }
  0xdd   :  { %854 = vrot.lane.b32.xlu1 %v842_v46, %s1524_s8  ;;  %852 = vrot.lane.b32.xlu0 %v841_v51, %s1524_s8  ;;  %v874_v46 = vmul.f32 %v873_v19, %v1603_v8 }
  0xdf   :  { %v1938_v32 = vpop.permute.xlu1 %443  ;;  %v1940_v33 = vpop.permute.xlu0 %441 }
  0xe0   :  { %2595 = vst [vmem:[#allocation15_spill] sm:$0xff] %v1938_v32  ;;  %2596 = vst [vmem:[#allocation16_spill] sm:$0xff] %v1940_v33  ;;  %v907_v33 = vstv %s1482_s6 }
  0xe1   :  { %858 = vrot.lane.b32.xlu1 %v844_v41, %s1524_s8  ;;  %856 = vrot.lane.b32.xlu0 %v843_v15, %s1524_s8 }
  0xe3   :  { %v1946_v14 = vpop.permute.xlu1 %447  ;;  %v1948_v51 = vpop.permute.xlu0 %445 }
  0xe4   :  { %2597 = vst [vmem:[#allocation17_spill] sm:$0xff] %v1946_v14  ;;  %2598 = vst [vmem:[#allocation18_spill] sm:$0xff] %v1948_v51  ;;  %v908_v14 = vmul.f32 %v907_v33, %v1603_v8  ;;  %v878_v51 = vmul.f32 %v1653_v18, %v873_v19  ;;  %v912_v19 = vmul.f32 %v1653_v18, %v907_v33 }
  0xe5   :  { %886 = vrot.lane.b32.xlu1 %v875_v13, %s1525_s10  ;;  %884 = vrot.lane.b32.xlu0 %v874_v46, %s1525_s10 }
  0xe7   :  { %v1954_v41 = vpop.permute.xlu1 %493  ;;  %v1956_v15 = vpop.permute.xlu0 %449 }
  0xe8   :  { %2599 = vst [vmem:[#allocation19_spill] sm:$0xff] %v1954_v41  ;;  %2600 = vst [vmem:[#allocation20_spill] sm:$0xff] %v1956_v15  ;;  %v910_v41 = vmul.f32 %v907_v33, %v1613_v10  ;;  %v909_v15 = vmul.f32 %v907_v33, %v1608_v9 }
  0xe9   :  { %890 = vrot.lane.b32.xlu1 %v877_v63, %s1525_s10  ;;  %888 = vrot.lane.b32.xlu0 %v876_v7, %s1525_s10 }
  0xeb   :  { %v1962_v13 = vpop.permute.xlu1 %497  ;;  %v1964_v46 = vpop.permute.xlu0 %495 }
  0xec   :  { %2601 = vst [vmem:[#allocation21_spill] sm:$0xff] %v1962_v13  ;;  %2602 = vst [vmem:[#allocation22_spill] sm:$0xff] %v1964_v46  ;;  %v911_v13 = vmul.f32 %v907_v33, %v1618_v11  ;;  %v941_v46 = vstv %s1483_s3 }
  0xed   :  { %918 = vrot.lane.b32.xlu1 %v908_v14, %s1526_s12  ;;  %892 = vrot.lane.b32.xlu0 %v878_v51, %s1525_s10  ;;  %v945_v33 = vmul.f32 %v941_v46, %v1618_v11 }
  0xef   :  { %v1970_v63 = vpop.permute.xlu1 %501  ;;  %v1972_v7 = vpop.permute.xlu0 %499 }
  0xf0   :  { %2603 = vst [vmem:[#allocation23_spill] sm:$0xff] %v1970_v63  ;;  %2604 = vst [vmem:[#allocation24_spill] sm:$0xff] %v1972_v7  ;;  %v943_v63 = vmul.f32 %v941_v46, %v1608_v9 }
  0xf1   :  { %922 = vrot.lane.b32.xlu1 %v910_v41, %s1526_s12  ;;  %920 = vrot.lane.b32.xlu0 %v909_v15, %s1526_s12  ;;  %v942_v41 = vmul.f32 %v941_v46, %v1603_v8 }
  0xf3   :  { %v1978_v14 = vpop.permute.xlu1 %529  ;;  %v1980_v51 = vpop.permute.xlu0 %527 }
  0xf4   :  { %2605 = vst [vmem:[#allocation25_spill] sm:$0xff] %v1978_v14  ;;  %2606 = vst [vmem:[#allocation26_spill] sm:$0xff] %v1980_v51  ;;  %v944_v51 = vmul.f32 %v941_v46, %v1613_v10  ;;  %v975_v14 = vstv %s1484_s9 }
  0xf5   :  { %926 = vrot.lane.b32.xlu1 %v912_v19, %s1526_s12  ;;  %924 = vrot.lane.b32.xlu0 %v911_v13, %s1526_s12 }
  0xf7   :  { %v1986_v7 = vpop.permute.xlu1 %533  ;;  %v1988_v15 = vpop.permute.xlu0 %531 }
  0xf8   :  { %2607 = vst [vmem:[#allocation27_spill] sm:$0xff] %v1986_v7  ;;  %2608 = vst [vmem:[#allocation28_spill] sm:$0xff] %v1988_v15  ;;  %v976_v7 = vmul.f32 %v975_v14, %v1603_v8  ;;  %v946_v15 = vmul.f32 %v1653_v18, %v941_v46  ;;  %v980_v46 = vmul.f32 %v1653_v18, %v975_v14 }
  0xf9   :  { %954 = vrot.lane.b32.xlu1 %v943_v63, %s1527_s14  ;;  %952 = vrot.lane.b32.xlu0 %v942_v41, %s1527_s14 }
  0xfb   :  { %v1994_v19 = vpop.permute.xlu1 %561  ;;  %v1996_v13 = vpop.permute.xlu0 %535 }
  0xfc   :  { %2609 = vst [vmem:[#allocation29_spill] sm:$0xff] %v1994_v19  ;;  %2610 = vst [vmem:[#allocation30_spill] sm:$0xff] %v1996_v13  ;;  %v978_v19 = vmul.f32 %v975_v14, %v1613_v10 }
  0xfd   :  { %958 = vrot.lane.b32.xlu1 %v945_v33, %s1527_s14  ;;  %956 = vrot.lane.b32.xlu0 %v944_v51, %s1527_s14  ;;  %v977_v33 = vmul.f32 %v975_v14, %v1608_v9 }
  0xff   :  { %v2002_v63 = vpop.permute.xlu1 %565  ;;  %v2004_v41 = vpop.permute.xlu0 %563 }
 0x100   :  { %2611 = vst [vmem:[#allocation31_spill] sm:$0xff] %v2002_v63  ;;  %2612 = vst [vmem:[#allocation32_spill] sm:$0xff] %v2004_v41  ;;  %v979_v63 = vmul.f32 %v975_v14, %v1618_v11  ;;  %v1009_v41 = vstv %s1485_s13  ;;  %v133_v14 = vstv %s2563_s1  ;;  %s2083_s1 = sld [smem:[#allocation3 + $0x1f]] }
 0x101   :  { %986 = vrot.lane.b32.xlu1 %v976_v7, %s1528_s16  ;;  %960 = vrot.lane.b32.xlu0 %v946_v15, %s1527_s14  ;;  %v140_v7 = vstv %s139_s11 }
 0x103   :  { %v2010_v13 = vpop.permute.xlu1 %569  ;;  %v2012_v51 = vpop.permute.xlu0 %567 }
 0x104   :  { %2613 = vst [vmem:[#allocation33_spill] sm:$0xff] %v2010_v13  ;;  %2614 = vst [vmem:[#allocation34_spill] sm:$0xff] %v2012_v51  ;;  %v143_v13 = vmul.f32 %v140_v7, %v1573_v2  ;;  %v141_v51 = vmul.f32 %v140_v7, %v1563_v0  ;;  %v1013_v0 = vmul.f32 %v1009_v41, %v1618_v11 }
 0x105   :  { %990 = vrot.lane.b32.xlu1 %v978_v19, %s1528_s16  ;;  %988 = vrot.lane.b32.xlu0 %v977_v33, %s1528_s16  ;;  %v1011_v19 = vmul.f32 %v1009_v41, %v1608_v9  ;;  %v1010_v33 = vmul.f32 %v1009_v41, %v1603_v8 }
 0x107   :  { %v2018_v15 = vpop.permute.xlu1 %597  ;;  %v2020_v32 = vpop.permute.xlu0 %595 }
 0x108   :  { %2615 = vst [vmem:[#allocation35_spill] sm:$0xff] %v2018_v15  ;;  %2616 = vst [vmem:[#allocation36_spill] sm:$0xff] %v2020_v32  ;;  %v142_v15 = vmul.f32 %v140_v7, %v1568_v1  ;;  %v144_v32 = vmul.f32 %v140_v7, %v1578_v3  ;;  %v1012_v1 = vmul.f32 %v1009_v41, %v1613_v10 }
 0x109   :  { %994 = vrot.lane.b32.xlu1 %v980_v46, %s1528_s16  ;;  %992 = vrot.lane.b32.xlu0 %v979_v63, %s1528_s16  ;;  %v147_v63 = vadd.f32 %v143_v13, %v133_v14  ;;  %v2039_v46 = vstv %s1468_s15  ;;  %v145_v3 = vadd.f32 %v141_v51, %v133_v14  ;;  %v172_v13 = vsel %vm171_vm0, %v1780_v49, %v1788_v53 }
 0x10a   :  { %v146_v7 = vadd.f32 %v142_v15, %v133_v14  ;;  %v173_v51 = vsel %vm171_vm0, %v1788_v53, %v1778_v48  ;;  %v2064_v15 = vmul.f32 %v2039_v46, %v1588_v5  ;;  %v2068_v49 = vmul.f32 %v2039_v46, %v1593_v6 }
 0x10b   :  { %v2033_v17 = vpop.permute.xlu1 %601  ;;  %v2035_v2 = vpop.permute.xlu0 %599  ;;  %v180_v53 = vadd.f32 %v172_v13, %v145_v3  ;;  %v207_v6 = vsel %vm206_vm1, %v1794_v57, %v1804_v62  ;;  %v209_v57 = vsel %vm206_vm1, %v1802_v61, %v1812_v22  ;;  %v1048_v3 = vmul.f32 %v1653_v18, %v1043_v60 }
 0x10c   :  { %2617 = vst [vmem:[#allocation37_spill] sm:$0xff] %v2033_v17  ;;  %2618 = vst [vmem:[#allocation38_spill] sm:$0xff] %v2035_v2  ;;  %v148_v17 = vadd.f32 %v144_v32, %v133_v14  ;;  %v174_v2 = vsel %vm171_vm0, %v1778_v48, %v1786_v52  ;;  %v2060_v32 = vmul.f32 %v2039_v46, %v1583_v4 }
 0x10d   :  { %1022 = vrot.lane.b32.xlu1 %v1011_v19, %s1529_s18  ;;  %1020 = vrot.lane.b32.xlu0 %v1010_v33, %s1529_s18  ;;  %v175_v14 = vsel %vm171_vm0, %v1786_v52, %v1796_v58  ;;  %v1044_v4 = vmul.f32 %v1043_v60, %v1603_v8  ;;  %v1014_v48 = vmul.f32 %v1653_v18, %v1009_v41 }
 0x10e   :  { %v182_v5 = vadd.f32 %v174_v2, %v147_v63  ;;  %v208_v52 = vsel %vm206_vm1, %v1804_v62, %v1802_v61  ;;  %v181_v58 = vadd.f32 %v173_v51, %v146_v7  ;;  %v1045_v41 = vmul.f32 %v1043_v60, %v1608_v9 }
 0x10f   :  { %v2051_v19 = vpop.permute.xlu1 %629  ;;  %v2053_v33 = vpop.permute.xlu0 %603  ;;  %v2092_v2 = vstv %s2037_s23  ;;  %v183_v63 = vadd.f32 %v175_v14, %v148_v17  ;;  %v210_v62 = vsel %vm206_vm1, %v1812_v22, %v1810_v21  ;;  %v215_v7 = vadd.f32 %v207_v6, %v180_v53 }
 0x110   :  { %2619 = vst [vmem:[#allocation39_spill] sm:$0xff] %v2051_v19  ;;  %v1046_v19 = vmul.f32 %v1043_v60, %v1613_v10  ;;  %v216_v13 = vadd.f32 %v208_v52, %v181_v58  ;;  %v1047_v51 = vmul.f32 %v1043_v60, %v1618_v11  ;;  %v242_v17 = vsel %vm241_vm2, %v1820_v27, %v1818_v26 }
 0x111   :  { %1026 = vrot.lane.b32.xlu1 %v1013_v0, %s1529_s18  ;;  %1024 = vrot.lane.b32.xlu0 %v1012_v1, %s1529_s18  ;;  %v243_v61 = vsel %vm241_vm2, %v1818_v26, %v1828_v31  ;;  %v1079_v21 = vmul.f32 %v2092_v2, %v1608_v9  ;;  %v1078_v22 = vmul.f32 %v2092_v2, %v1603_v8 }
 0x112   :  { %v217_v14 = vadd.f32 %v209_v57, %v182_v5  ;;  %v244_v60 = vsel %vm241_vm2, %v1828_v31, %v1826_v30  ;;  %v2123_v26 = vmul.f32 %v2092_v2, %v1618_v11  ;;  %v245_v53 = vsel %vm241_vm2, %v1826_v30, %v1836_v36 }
 0x113   :  { %v2085_v0 = vpop.permute.xlu1 %633  ;;  %v2087_v1 = vpop.permute.xlu0 %631  ;;  %v277_v5 = vsel %vm276_vm3, %v1834_v35, %v1844_v39  ;;  %v278_v31 = vsel %vm276_vm3, %v1844_v39, %v1842_v38  ;;  %v2136_v6 = vmul.f32 %v2092_v2, %v1613_v10  ;;  %v250_v52 = vadd.f32 %v242_v17, %v215_v7 }
 0x114   :  { %v251_v58 = vadd.f32 %v243_v61, %v216_v13  ;;  %v252_v30 = vadd.f32 %v244_v60, %v217_v14  ;;  %v280_v35 = vsel %vm276_vm3, %v1852_v43, %v1850_v42  ;;  %v312_v36 = vsel %vm311_vm4, %v1860_v50, %v1858_v47 }
 0x115   :  { %1054 = vrot.lane.b32.xlu1 %v1044_v4, %s1530_s20  ;;  %1028 = vrot.lane.b32.xlu0 %v1014_v48, %s1529_s18  ;;  %v218_v4 = vadd.f32 %v210_v62, %v183_v63  ;;  %v279_v63 = vsel %vm276_vm3, %v1842_v38, %v1852_v43  ;;  %v2150_v39 = vstv %s2083_s1  ;;  %v285_v62 = vadd.f32 %v277_v5, %v250_v52  ;;  %v2620_v52 = vld [vmem:[#allocation14_spill] sm:$0xff] }
 0x116   :  { %v286_v7 = vadd.f32 %v278_v31, %v251_v58  ;;  %v313_v38 = vsel %vm311_vm4, %v1858_v47, %v1868_v56  ;;  %v287_v13 = vadd.f32 %v279_v63, %v252_v30  ;;  %v314_v42 = vsel %vm311_vm4, %v1868_v56, %v1866_v55  ;;  %v2621_v30 = vld [vmem:[#allocation13_spill] sm:$0xff] }
 0x117   :  { %v2117_v48 = vpop.permute.xlu1 %637  ;;  %v2119_v27 = vpop.permute.xlu0 %635  ;;  %v253_v57 = vadd.f32 %v245_v53, %v218_v4  ;;  %v315_v43 = vsel %vm311_vm4, %v1866_v55, %v1876_v23  ;;  %v347_v50 = vsel %vm346_vm5, %v1874_v20, %v1884_v29  ;;  %v320_v61 = vadd.f32 %v312_v36, %v285_v62  ;;  %v2622_v36 = vld [vmem:[#allocation15_spill] sm:$0xff]  ;;  %v2624_v62 = vld [vmem:[#allocation18_spill] sm:$0xff] }
 0x118   :  { %v348_v47 = vsel %vm346_vm5, %v1884_v29, %v1882_v28  ;;  %v321_v56 = vadd.f32 %v313_v38, %v286_v7  ;;  %v349_v55 = vsel %vm346_vm5, %v1882_v28, %v1892_v16  ;;  %v350_v20 = vsel %vm346_vm5, %v1892_v16, %v1890_v34 }
 0x119   :  { %1058 = vrot.lane.b32.xlu1 %v1046_v19, %s1530_s20  ;;  %1056 = vrot.lane.b32.xlu0 %v1045_v41, %s1530_s20  ;;  %v288_v17 = vadd.f32 %v280_v35, %v253_v57  ;;  %v1129_v23 = vmul.f32 %v2150_v39, %v1623_v12  ;;  %v322_v29 = vadd.f32 %v314_v42, %v287_v13  ;;  %v2623_v57 = vld [vmem:[#allocation16_spill] sm:$0xff] }
 0x11a   :  { %v355_v4 = vadd.f32 %v347_v50, %v320_v61  ;;  %v356_v28 = vadd.f32 %v348_v47, %v321_v56  ;;  %v383_v34 = vsel %vm381_vm6, %v1898_v44, %v1908_v59  ;;  %v384_v16 = vsel %vm381_vm6, %v1908_v59, %v1906_v54  ;;  %v2626_v42 = vld [vmem:[#allocation20_spill] sm:$0xff]  ;;  %v2628_v47 = vld [vmem:[#allocation10_spill] sm:$0xff] }
 0x11b   :  { %v2155_v19 = vpop.permute.xlu1 %665  ;;  %v2157_v41 = vpop.permute.xlu0 %663  ;;  %v323_v14 = vadd.f32 %v315_v43, %v288_v17  ;;  %v385_v53 = vsel %vm381_vm6, %v1906_v54, %v1916_v25  ;;  %v417_v31 = vsel %vm416_vm7, %v1914_v24, %v1924_v40  ;;  %v418_v59 = vsel %vm416_vm7, %v1924_v40, %v1922_v37  ;;  %v2627_v17 = vld [vmem:[#allocation8_spill] sm:$0xff] }
 0x11c   :  { %v419_v54 = vsel %vm416_vm7, %v1922_v37, %v2620_v52  ;;  %v1082_v25 = vmul.f32 %v1653_v18, %v2092_v2  ;;  %v391_v58 = vadd.f32 %v383_v34, %v356_v28  ;;  %v452_v37 = vsel %vm451_vm8, %v2623_v57, %v2622_v36  ;;  %v2625_v2 = vld [vmem:[#allocation17_spill] sm:$0xff] }
 0x11d   :  { %1062 = vrot.lane.b32.xlu1 %v1048_v3, %s1530_s20  ;;  %1060 = vrot.lane.b32.xlu0 %v1047_v51, %s1530_s20  ;;  %v382_v3 = vsel %vm381_vm6, %v1900_v45, %v1898_v44  ;;  %v357_v45 = vadd.f32 %v349_v55, %v322_v29  ;;  %v358_v5 = vadd.f32 %v350_v20, %v323_v14  ;;  %v2242_v55 = vstv %s2181_s24 }
 0x11e   :  { %v390_v44 = vadd.f32 %v382_v3, %v355_v4  ;;  %v453_v18 = vsel %vm451_vm8, %v2622_v36, %v2624_v62  ;;  %v454_v7 = vsel %vm451_vm8, %v2624_v62, %v2625_v2  ;;  %v426_v38 = vadd.f32 %v418_v59, %v391_v58  ;;  %v2632_v59 = vld [vmem:[#allocation22_spill] sm:$0xff]  ;;  %v2634_v58 = vld [vmem:[#allocation21_spill] sm:$0xff]  ;;  %v2636_v62 = vld [vmem:[#allocation23_spill] sm:$0xff] }
 0x11f   :  { %v2186_v51 = vpop.permute.xlu1 %669  ;;  %v2188_v60 = vpop.permute.xlu0 %667  ;;  %v392_v63 = vadd.f32 %v384_v16, %v357_v45  ;;  %v393_v24 = vadd.f32 %v385_v53, %v358_v5  ;;  %v455_v43 = vsel %vm451_vm8, %v2625_v2, %v2626_v42  ;;  %v476_v61 = vmul.f32 %v2039_v46, %v2627_v17  ;;  %v2630_v46 = vld [vmem:[#allocation12_spill] sm:$0xff]  ;;  %v2631_v53 = vld [vmem:[#allocation11_spill] sm:$0xff]  ;;  %v2637_v2 = vld [vmem:[#allocation25_spill] sm:$0xff] }
 0x120   :  { %v425_v40 = vadd.f32 %v417_v31, %v390_v44  ;;  %v1131_v56 = vmul.f32 %v2150_v39, %v2628_v47  ;;  %v461_v29 = vadd.f32 %v453_v18, %v426_v38  ;;  %v1133_v16 = vmul.f32 %v2630_v46, %v2150_v39  ;;  %v2640_v42 = vld [vmem:[#allocation27_spill] sm:$0xff]  ;;  %v2641_v17 = vld [vmem:[#allocation30_spill] sm:$0xff] }
 0x121   :  { %1090 = vrot.lane.b32.xlu1 %v1079_v21, %s1531_s22  ;;  %1088 = vrot.lane.b32.xlu0 %v1078_v22, %s1531_s22  ;;  %v420_v21 = vsel %vm416_vm7, %v2620_v52, %v2621_v30  ;;  %v427_v13 = vadd.f32 %v419_v54, %v392_v63  ;;  %v1132_v45 = vmul.f32 %v2150_v39, %v2631_v53  ;;  %v2633_v52 = vld [vmem:[#allocation19_spill] sm:$0xff] }
 0x122   :  { %v428_v50 = vadd.f32 %v420_v21, %v393_v24  ;;  %v460_v20 = vadd.f32 %v452_v37, %v425_v40  ;;  %v1163_v31 = vmul.f32 %v2242_v55, %v1623_v12  ;;  %v2265_v44 = vmul.f32 %v2242_v55, %v2631_v53  ;;  %v2635_v21 = vld [vmem:[#allocation24_spill] sm:$0xff] }
 0x123   :  { %v2217_v22 = vpop.permute.xlu1 %697  ;;  %v2219_v35 = vpop.permute.xlu0 %671  ;;  %v462_v14 = vadd.f32 %v454_v7, %v427_v13  ;;  %v503_v54 = vsel %vm171_vm0, %v2633_v52, %v2632_v59  ;;  %v478_v24 = vadd.f32 %v2064_v15, %v461_v29  ;;  %v505_v40 = vsel %vm171_vm0, %v2634_v58, %v2635_v21  ;;  %v2638_v7 = vld [vmem:[#allocation26_spill] sm:$0xff]  ;;  %v2639_v15 = vld [vmem:[#allocation28_spill] sm:$0xff]  ;;  %v2643_v29 = vld [vmem:[#allocation29_spill] sm:$0xff] }
 0x124   :  { %v463_v28 = vadd.f32 %v455_v43, %v428_v50  ;;  %v477_v63 = vadd.f32 %v2060_v32, %v460_v20  ;;  %v506_v18 = vsel %vm171_vm0, %v2635_v21, %v2636_v62  ;;  %v537_v32 = vsel %vm206_vm1, %v2638_v7, %v2637_v2  ;;  %v2642_v20 = vld [vmem:[#allocation32_spill] sm:$0xff]  ;;  %v2649_v7 = vld [vmem:[#allocation38_spill] sm:$0xff] }
 0x125   :  { %1094 = vrot.lane.b32.xlu1 %v2123_v26, %s1531_s22  ;;  %1092 = vrot.lane.b32.xlu0 %v2136_v6, %s1531_s22  ;;  %v2249_v26 = vstv %s2190_s25  ;;  %v2629_v6 = vld [vmem:[#allocation9_spill] sm:$0xff]  ;;  %v479_v30 = vadd.f32 %v2068_v49, %v462_v14  ;;  %v538_v49 = vsel %vm206_vm1, %v2637_v2, %v2639_v15  ;;  %v539_v43 = vsel %vm206_vm1, %v2639_v15, %v2640_v42  ;;  %v2648_v62 = vld [vmem:[#allocation36_spill] sm:$0xff] }
 0x126   :  { %v1130_v34 = vmul.f32 %v2150_v39, %v2629_v6  ;;  %v1164_v5 = vmul.f32 %v2242_v55, %v2629_v6  ;;  %v504_v39 = vsel %vm171_vm0, %v2632_v59, %v2634_v58  ;;  %v480_v37 = vadd.f32 %v476_v61, %v463_v28  ;;  %v2644_v28 = vld [vmem:[#allocation31_spill] sm:$0xff] }
 0x127   :  { %v2244_v4 = vpop.permute.xlu1 %701  ;;  %v2246_v3 = vpop.permute.xlu0 %699  ;;  %v511_v38 = vadd.f32 %v503_v54, %v477_v63  ;;  %v512_v13 = vadd.f32 %v504_v39, %v478_v24  ;;  %v513_v50 = vadd.f32 %v505_v40, %v479_v30  ;;  %v540_v61 = vsel %vm206_vm1, %v2640_v42, %v2641_v17  ;;  %v2645_v39 = vld [vmem:[#allocation34_spill] sm:$0xff]  ;;  %v2646_v30 = vld [vmem:[#allocation33_spill] sm:$0xff]  ;;  %v2647_v40 = vld [vmem:[#allocation35_spill] sm:$0xff] }
 0x128   :  { %v571_v14 = vsel %vm241_vm2, %v2643_v29, %v2642_v20  ;;  %v572_v59 = vsel %vm241_vm2, %v2642_v20, %v2644_v28  ;;  %v514_v52 = vadd.f32 %v506_v18, %v480_v37  ;;  %v574_v21 = vsel %vm241_vm2, %v2645_v39, %v2646_v30 }
 0x129   :  { %1139 = vrot.lane.b32.xlu1 %v1129_v23, %s1523_s7  ;;  %1096 = vrot.lane.b32.xlu0 %v1082_v25, %s1531_s22  ;;  %v2275_v23 = vmul.f32 %v2242_v55, %v2628_v47  ;;  %v2279_v25 = vmul.f32 %v2249_v26, %v1623_v12  ;;  %v545_v54 = vadd.f32 %v537_v32, %v511_v38  ;;  %v2650_v38 = vld [vmem:[#allocation37_spill] sm:$0xff] }
 0x12a   :  { %v546_v58 = vadd.f32 %v538_v49, %v512_v13  ;;  %v547_v24 = vadd.f32 %v539_v43, %v513_v50  ;;  %v605_v2 = vsel %vm276_vm3, %v2648_v62, %v2647_v40  ;;  %v606_v37 = vsel %vm276_vm3, %v2647_v40, %v2649_v7 }
 0x12b   :  { %v2287_v36 = vpop.permute.xlu1 %705  ;;  %v2289_v57 = vpop.permute.xlu0 %703  ;;  %v548_v18 = vadd.f32 %v540_v61, %v514_v52  ;;  %v579_v32 = vadd.f32 %v571_v14, %v545_v54  ;;  %v607_v13 = vsel %vm276_vm3, %v2649_v7, %v2650_v38  ;;  %v608_v42 = vsel %vm276_vm3, %v2650_v38, %v2053_v33 }
 0x12c   :  { %v580_v15 = vadd.f32 %v572_v59, %v546_v58  ;;  %v640_v43 = vsel %vm311_vm4, %v2087_v1, %v2085_v0  ;;  %v641_v14 = vsel %vm311_vm4, %v2085_v0, %v2119_v27  ;;  %v642_v33 = vsel %vm311_vm4, %v2119_v27, %v2117_v48 }
 0x12d   :  { %1143 = vrot.lane.b32.xlu1 %v1131_v56, %s1523_s7  ;;  %1141 = vrot.lane.b32.xlu0 %v1130_v34, %s1523_s7  ;;  %v573_v56 = vsel %vm241_vm2, %v2644_v28, %v2645_v39  ;;  %v582_v50 = vadd.f32 %v574_v21, %v548_v18  ;;  %v613_v17 = vadd.f32 %v605_v2, %v579_v32 }
 0x12e   :  { %v581_v49 = vadd.f32 %v573_v56, %v547_v24  ;;  %v674_v28 = vsel %vm346_vm5, %v2155_v19, %v2188_v60  ;;  %v673_v0 = vsel %vm346_vm5, %v2157_v41, %v2155_v19  ;;  %v708_v48 = vsel %vm381_vm6, %v2246_v3, %v2244_v4 }
 0x12f   :  { %v734_v34 = vpop.permute.xlu1 %733  ;;  %v732_v63 = vpop.permute.xlu0 %731  ;;  %v616_v54 = vadd.f32 %v608_v42, %v582_v50  ;;  %v1167_v27 = vmul.f32 %v2630_v46, %v2242_v55  ;;  %v676_v19 = vsel %vm346_vm5, %v2186_v51, %v2219_v35  ;;  %v707_v41 = vsel %vm381_vm6, %v2217_v22, %v2246_v3 }
 0x130   :  { %v615_v52 = vadd.f32 %v607_v13, %v581_v49  ;;  %v710_v22 = vsel %vm381_vm6, %v2289_v57, %v2287_v36  ;;  %v741_v35 = vsel %vm416_vm7, %v732_v63, %v734_v34  ;;  %v795_v3 = vstv %s2337_s0 }
 0x131   :  { %1147 = vrot.lane.b32.xlu1 %v1133_v16, %s1523_s7  ;;  %1145 = vrot.lane.b32.xlu0 %v1132_v45, %s1523_s7  ;;  %v614_v16 = vadd.f32 %v606_v37, %v580_v15  ;;  %v2651_v45 = vld [vmem:[#allocation39_spill] sm:$0xff]  ;;  %v650_v56 = vadd.f32 %v642_v33, %v616_v54  ;;  %s1492_s7 = sld [smem:[#allocation3 + $0x22]]  ;;  %v1198_v36 = vmul.f32 %v2249_v26, %v2629_v6 }
 0x132   :  { %v639_v61 = vsel %vm311_vm4, %v2651_v45, %v2087_v1  ;;  %v649_v39 = vadd.f32 %v641_v14, %v615_v52  ;;  %v796_v50 = vmul.f32 %v795_v3, %v1603_v8  ;;  %v1201_v45 = vmul.f32 %v2630_v46, %v2249_v26 }
 0x133   :  { %v738_v20 = vpop.permute.xlu1 %737  ;;  %v736_v29 = vpop.permute.xlu0 %735  ;;  %v648_v58 = vadd.f32 %v640_v43, %v614_v16  ;;  %v647_v1 = vadd.f32 %v639_v61, %v613_v17  ;;  %v684_v2 = vadd.f32 %v676_v19, %v650_v56 }
 0x134   :  { %v743_v59 = vsel %vm416_vm7, %v736_v29, %v738_v20  ;;  %v742_v55 = vsel %vm416_vm7, %v734_v34, %v736_v29 }
 0x135   :  { %1175 = vrot.lane.b32.xlu1 %v1164_v5, %s1524_s8  ;;  %1173 = vrot.lane.b32.xlu0 %v1163_v31, %s1524_s8  ;;  %v675_v5 = vsel %vm346_vm5, %v2188_v60, %v2186_v51  ;;  %v682_v31 = vadd.f32 %v674_v28, %v648_v58  ;;  %v681_v40 = vadd.f32 %v673_v0, %v647_v1 }
 0x136   :  { %v709_v60 = vsel %vm381_vm6, %v2244_v4, %v2289_v57  ;;  %v683_v51 = vadd.f32 %v675_v5, %v649_v39  ;;  %v718_v57 = vadd.f32 %v710_v22, %v684_v2  ;;  %v797_v28 = vmul.f32 %v795_v3, %v1608_v9 }
 0x137   :  { %v766_v24 = vpop.permute.xlu1 %765  ;;  %v740_v30 = vpop.permute.xlu0 %739  ;;  %v716_v62 = vadd.f32 %v708_v48, %v682_v31  ;;  %v715_v7 = vadd.f32 %v707_v41, %v681_v40  ;;  %v1230_v29 = vstv %s1492_s7  ;;  %v799_v39 = vmul.f32 %v795_v3, %v1618_v11 }
 0x138   :  { %v744_v21 = vsel %vm416_vm7, %v738_v20, %v740_v30  ;;  %v717_v32 = vadd.f32 %v709_v60, %v683_v51  ;;  %v1232_v58 = vmul.f32 %v1230_v29, %v2629_v6  ;;  %v1234_v56 = vmul.f32 %v1230_v29, %v2631_v53 }
 0x139   :  { %1179 = vrot.lane.b32.xlu1 %v2265_v44, %s1524_s8  ;;  %1177 = vrot.lane.b32.xlu0 %v2275_v23, %s1524_s8  ;;  %v750_v37 = vadd.f32 %v742_v55, %v716_v62  ;;  %v1199_v44 = vmul.f32 %v2249_v26, %v2628_v47  ;;  %v749_v34 = vadd.f32 %v741_v35, %v715_v7 }
 0x13a   :  { %v751_v49 = vadd.f32 %v743_v59, %v717_v32  ;;  %v752_v38 = vadd.f32 %v744_v21, %v718_v57  ;;  %v798_v59 = vmul.f32 %v795_v3, %v1613_v10  ;;  %v1235_v62 = vmul.f32 %v2630_v46, %v1230_v29 }
 0x13b   :  { %v770_v18 = vpop.permute.xlu1 %769  ;;  %v768_v4 = vpop.permute.xlu0 %767 }
 0x13c   :  { %v775_v23 = vsel %vm451_vm8, %v766_v24, %v768_v4  ;;  %v776_v15 = vsel %vm451_vm8, %v768_v4, %v770_v18  ;;  %v1233_v24 = vmul.f32 %v1230_v29, %v2628_v47 }
 0x13d   :  { %v784_v63 = vadd.f32 %v776_v15, %v750_v37  ;;  %1207 = vrot.lane.b32.xlu1 %v2279_v25, %s1525_s10  ;;  %1181 = vrot.lane.b32.xlu0 %v1167_v27, %s1524_s8  ;;  %v783_v13 = vadd.f32 %v775_v23, %v749_v34  ;;  %v1200_v25 = vmul.f32 %v2249_v26, %v2631_v53  ;;  %s1493_s8 = sld [smem:[#allocation3 + $0x23]] }
 0x13e   :  { %v1231_v26 = vmul.f32 %v1230_v29, %v1623_v12 }
 0x13f   :  { %v774_v42 = vpop.permute.xlu1 %773  ;;  %v772_v43 = vpop.permute.xlu0 %771  ;;  %v800_v33 = vadd.f32 %v796_v50, %v783_v13  ;;  %v801_v48 = vadd.f32 %v797_v28, %v784_v63 }
 0x140   :  { %v777_v17 = vsel %vm451_vm8, %v770_v18, %v772_v43  ;;  %v778_v16 = vsel %vm451_vm8, %v772_v43, %v774_v42 }
 0x141   :  { %v785_v61 = vadd.f32 %v777_v17, %v751_v49  ;;  %v786_v20 = vadd.f32 %v778_v16, %v752_v38  ;;  %1211 = vrot.lane.b32.xlu1 %v1199_v44, %s1525_s10  ;;  %1209 = vrot.lane.b32.xlu0 %v1198_v36, %s1525_s10 }
 0x143   :  { %v819_v14 = vpop.permute.xlu1 %818  ;;  %v817_v8 = vpop.permute.xlu0 %816  ;;  %v802_v27 = vadd.f32 %v798_v59, %v785_v61  ;;  %v1264_v30 = vstv %s1493_s8  ;;  %v803_v55 = vadd.f32 %v799_v39, %v786_v20 }
 0x144   :  { %v826_v52 = vsel %vm171_vm0, %v817_v8, %v819_v14  ;;  %v1265_v40 = vmul.f32 %v1264_v30, %v1623_v12  ;;  %v1267_v3 = vmul.f32 %v1264_v30, %v2628_v47  ;;  %v1266_v37 = vmul.f32 %v1264_v30, %v2629_v6 }
 0x145   :  { %v834_v54 = vadd.f32 %v826_v52, %v800_v33  ;;  %1215 = vrot.lane.b32.xlu1 %v1201_v45, %s1525_s10  ;;  %1213 = vrot.lane.b32.xlu0 %v1200_v25, %s1525_s10  ;;  %s1494_s10 = sld [smem:[#allocation3 + $0x24]]  ;;  %v1269_v23 = vmul.f32 %v2630_v46, %v1264_v30  ;;  %v1268_v57 = vmul.f32 %v1264_v30, %v2631_v53 }
 0x147   :  { %v823_v1 = vpop.permute.xlu1 %822  ;;  %v821_v0 = vpop.permute.xlu0 %820 }
 0x148   :  { %v827_v9 = vsel %vm171_vm0, %v819_v14, %v821_v0  ;;  %v828_v10 = vsel %vm171_vm0, %v821_v0, %v823_v1 }
 0x149   :  { %v835_v5 = vadd.f32 %v827_v9, %v801_v48  ;;  %v836_v31 = vadd.f32 %v828_v10, %v802_v27  ;;  %1243 = vrot.lane.b32.xlu1 %v1232_v58, %s1526_s12  ;;  %1241 = vrot.lane.b32.xlu0 %v1231_v26, %s1526_s12 }
 0x14b   :  { %v851_v19 = vpop.permute.xlu1 %850  ;;  %v825_v41 = vpop.permute.xlu0 %824  ;;  %v1298_v34 = vstv %s1494_s10 }
 0x14c   :  { %v829_v11 = vsel %vm171_vm0, %v823_v1, %v825_v41  ;;  %v1300_v42 = vmul.f32 %v1298_v34, %v2629_v6  ;;  %v1299_v43 = vmul.f32 %v1298_v34, %v1623_v12  ;;  %v1302_v61 = vmul.f32 %v1298_v34, %v2631_v53 }
 0x14d   :  { %v837_v21 = vadd.f32 %v829_v11, %v803_v55  ;;  %1247 = vrot.lane.b32.xlu1 %v1234_v56, %s1526_s12  ;;  %1245 = vrot.lane.b32.xlu0 %v1233_v24, %s1526_s12  ;;  %v1301_v29 = vmul.f32 %v1298_v34, %v2628_v47 }
 0x14f   :  { %v855_v60 = vpop.permute.xlu1 %854  ;;  %v853_v51 = vpop.permute.xlu0 %852 }
 0x150   :  { %v860_v22 = vsel %vm206_vm1, %v851_v19, %v853_v51  ;;  %v861_v35 = vsel %vm206_vm1, %v853_v51, %v855_v60 }
 0x151   :  { %v868_v2 = vadd.f32 %v860_v22, %v834_v54  ;;  %v869_v7 = vadd.f32 %v861_v35, %v835_v5  ;;  %1275 = vrot.lane.b32.xlu1 %v1265_v40, %s1527_s14  ;;  %1249 = vrot.lane.b32.xlu0 %v1235_v62, %s1526_s12  ;;  %s1495_s12 = sld [smem:[#allocation3 + $0x25]]  ;;  %v1303_v54 = vmul.f32 %v2630_v46, %v1298_v34 }
 0x153   :  { %v859_v18 = vpop.permute.xlu1 %858  ;;  %v857_v4 = vpop.permute.xlu0 %856 }
 0x154   :  { %v862_v44 = vsel %vm206_vm1, %v855_v60, %v857_v4  ;;  %v863_v32 = vsel %vm206_vm1, %v857_v4, %v859_v18 }
 0x155   :  { %v870_v15 = vadd.f32 %v862_v44, %v836_v31  ;;  %v871_v36 = vadd.f32 %v863_v32, %v837_v21  ;;  %1279 = vrot.lane.b32.xlu1 %v1267_v3, %s1527_s14  ;;  %1277 = vrot.lane.b32.xlu0 %v1266_v37, %s1527_s14 }
 0x157   :  { %v887_v63 = vpop.permute.xlu1 %886  ;;  %v885_v49 = vpop.permute.xlu0 %884  ;;  %v1332_v14 = vstv %s1495_s12 }
 0x158   :  { %v894_v38 = vsel %vm241_vm2, %v885_v49, %v887_v63  ;;  %v1333_v52 = vmul.f32 %v1332_v14, %v1623_v12  ;;  %v1335_v48 = vmul.f32 %v1332_v14, %v2628_v47  ;;  %v1334_v9 = vmul.f32 %v1332_v14, %v2629_v6 }
 0x159   :  { %v902_v13 = vadd.f32 %v894_v38, %v868_v2  ;;  %1283 = vrot.lane.b32.xlu1 %v1269_v23, %s1527_s14  ;;  %1281 = vrot.lane.b32.xlu0 %v1268_v57, %s1527_s14  ;;  %s1496_s14 = sld [smem:[#allocation3 + $0x26]]  ;;  %v1337_v24 = vmul.f32 %v2630_v46, %v1332_v14  ;;  %v1336_v41 = vmul.f32 %v1332_v14, %v2631_v53 }
 0x15b   :  { %v891_v50 = vpop.permute.xlu1 %890  ;;  %v889_v17 = vpop.permute.xlu0 %888 }
 0x15c   :  { %v895_v16 = vsel %vm241_vm2, %v887_v63, %v889_v17  ;;  %v896_v45 = vsel %vm241_vm2, %v889_v17, %v891_v50 }
 0x15d   :  { %v903_v20 = vadd.f32 %v895_v16, %v869_v7  ;;  %v904_v25 = vadd.f32 %v896_v45, %v870_v15  ;;  %1311 = vrot.lane.b32.xlu1 %v1300_v42, %s1528_s16  ;;  %1309 = vrot.lane.b32.xlu0 %v1299_v43, %s1528_s16 }
 0x15f   :  { %v919_v8 = vpop.permute.xlu1 %918  ;;  %v893_v33 = vpop.permute.xlu0 %892  ;;  %v1366_v55 = vstv %s1496_s14 }
 0x160   :  { %v897_v28 = vsel %vm241_vm2, %v891_v50, %v893_v33  ;;  %v1368_v60 = vmul.f32 %v1366_v55, %v2629_v6  ;;  %v1367_v51 = vmul.f32 %v1366_v55, %v1623_v12  ;;  %v1370_v7 = vmul.f32 %v1366_v55, %v2631_v53 }
 0x161   :  { %v905_v59 = vadd.f32 %v897_v28, %v871_v36  ;;  %1315 = vrot.lane.b32.xlu1 %v1302_v61, %s1528_s16  ;;  %1313 = vrot.lane.b32.xlu0 %v1301_v29, %s1528_s16  ;;  %v1369_v4 = vmul.f32 %v1366_v55, %v2628_v47  ;;  %v1371_v34 = vmul.f32 %v2630_v46, %v1366_v55 }
 0x163   :  { %v923_v58 = vpop.permute.xlu1 %922  ;;  %v921_v26 = vpop.permute.xlu0 %920 }
 0x164   :  { %v928_v1 = vsel %vm276_vm3, %v919_v8, %v921_v26  ;;  %v929_v0 = vsel %vm276_vm3, %v921_v26, %v923_v58 }
 0x165   :  { %v936_v27 = vadd.f32 %v928_v1, %v902_v13  ;;  %v937_v39 = vadd.f32 %v929_v0, %v903_v20  ;;  %1343 = vrot.lane.b32.xlu1 %v1333_v52, %s1529_s18  ;;  %1317 = vrot.lane.b32.xlu0 %v1303_v54, %s1528_s16  ;;  %s1497_s16 = sld [smem:[#allocation3 + $0x27]] }
 0x167   :  { %v927_v10 = vpop.permute.xlu1 %926  ;;  %v925_v56 = vpop.permute.xlu0 %924 }
 0x168   :  { %v930_v5 = vsel %vm276_vm3, %v923_v58, %v925_v56  ;;  %v931_v31 = vsel %vm276_vm3, %v925_v56, %v927_v10 }
 0x169   :  { %v938_v30 = vadd.f32 %v930_v5, %v904_v25  ;;  %v939_v19 = vadd.f32 %v931_v31, %v905_v59  ;;  %1347 = vrot.lane.b32.xlu1 %v1335_v48, %s1529_s18  ;;  %1345 = vrot.lane.b32.xlu0 %v1334_v9, %s1529_s18 }
 0x16b   :  { %v955_v11 = vpop.permute.xlu1 %954  ;;  %v953_v21 = vpop.permute.xlu0 %952  ;;  %v1400_v44 = vstv %s1497_s16 }
 0x16c   :  { %v962_v40 = vsel %vm311_vm4, %v953_v21, %v955_v11  ;;  %v1401_v57 = vmul.f32 %v1400_v44, %v1623_v12  ;;  %v1403_v42 = vmul.f32 %v1400_v44, %v2628_v47  ;;  %v1402_v17 = vmul.f32 %v1400_v44, %v2629_v6 }
 0x16d   :  { %v970_v62 = vadd.f32 %v962_v40, %v936_v27  ;;  %1351 = vrot.lane.b32.xlu1 %v1337_v24, %s1529_s18  ;;  %1349 = vrot.lane.b32.xlu0 %v1336_v41, %s1529_s18  ;;  %v1405_v25 = vmul.f32 %v2630_v46, %v1400_v44  ;;  %v1404_v8 = vmul.f32 %v1400_v44, %v2631_v53  ;;  %s1488_s18 = sld [smem:[#allocation3 + $0x1e]] }
 0x16f   :  { %v959_v22 = vpop.permute.xlu1 %958  ;;  %v957_v35 = vpop.permute.xlu0 %956 }
 0x170   :  { %v963_v3 = vsel %vm311_vm4, %v955_v11, %v957_v35  ;;  %v964_v2 = vsel %vm311_vm4, %v957_v35, %v959_v22 }
 0x171   :  { %v971_v37 = vadd.f32 %v963_v3, %v937_v39  ;;  %v972_v18 = vadd.f32 %v964_v2, %v938_v30  ;;  %1379 = vrot.lane.b32.xlu1 %v1368_v60, %s1530_s20  ;;  %1377 = vrot.lane.b32.xlu0 %v1367_v51, %s1530_s20 }
 0x173   :  { %v987_v32 = vpop.permute.xlu1 %986  ;;  %v961_v23 = vpop.permute.xlu0 %960 }
 0x174   :  { %v965_v15 = vsel %vm311_vm4, %v959_v22, %v961_v23 }
 0x175   :  { %v973_v36 = vadd.f32 %v965_v15, %v939_v19  ;;  %1383 = vrot.lane.b32.xlu1 %v1370_v7, %s1530_s20  ;;  %1381 = vrot.lane.b32.xlu0 %v1369_v4, %s1530_s20 }
 0x177   :  { %v991_v63 = vpop.permute.xlu1 %990  ;;  %v989_v49 = vpop.permute.xlu0 %988 }
 0x178   :  { %v996_v38 = vsel %vm346_vm5, %v987_v32, %v989_v49  ;;  %v997_v13 = vsel %vm346_vm5, %v989_v49, %v991_v63 }
 0x179   :  { %v1004_v43 = vadd.f32 %v996_v38, %v970_v62  ;;  %v1005_v50 = vadd.f32 %v997_v13, %v971_v37  ;;  %1411 = vrot.lane.b32.xlu1 %v1401_v57, %s1531_s22  ;;  %1385 = vrot.lane.b32.xlu0 %v1371_v34, %s1530_s20  ;;  %v1118_v37 = vstv %s1488_s18 }
 0x17a   :  { %v1119_v23 = vmul.f32 %v1118_v37, %v1623_v12  ;;  %v1120_v15 = vmul.f32 %v1118_v37, %v2629_v6  ;;  %v1121_v13 = vmul.f32 %v1118_v37, %v2628_v47 }
 0x17b   :  { %v995_v16 = vpop.permute.xlu1 %994  ;;  %v993_v45 = vpop.permute.xlu0 %992 }
 0x17c   :  { %v998_v61 = vsel %vm346_vm5, %v991_v63, %v993_v45  ;;  %v999_v20 = vsel %vm346_vm5, %v993_v45, %v995_v16 }
 0x17d   :  { %v1006_v29 = vadd.f32 %v998_v61, %v972_v18  ;;  %v1007_v14 = vadd.f32 %v999_v20, %v973_v36  ;;  %1415 = vrot.lane.b32.xlu1 %v1403_v42, %s1531_s22  ;;  %1413 = vrot.lane.b32.xlu0 %v1402_v17, %s1531_s22  ;;  %v1122_v42 = vmul.f32 %v1118_v37, %v2631_v53 }
 0x17f   :  { %v1023_v33 = vpop.permute.xlu1 %1022  ;;  %v1021_v28 = vpop.permute.xlu0 %1020 }
 0x180   :  { %v1030_v59 = vsel %vm381_vm6, %v1021_v28, %v1023_v33 }
 0x181   :  { %v1038_v52 = vadd.f32 %v1030_v59, %v1004_v43  ;;  %1419 = vrot.lane.b32.xlu1 %v1405_v25, %s1531_s22  ;;  %1417 = vrot.lane.b32.xlu0 %v1404_v8, %s1531_s22 }
 0x183   :  { %v1027_v54 = vpop.permute.xlu1 %1026  ;;  %v1025_v58 = vpop.permute.xlu0 %1024 }
 0x184   :  { %v1031_v46 = vsel %vm381_vm6, %v1023_v33, %v1025_v58  ;;  %v1032_v26 = vsel %vm381_vm6, %v1025_v58, %v1027_v54 }
 0x185   :  { %v1039_v1 = vadd.f32 %v1031_v46, %v1005_v50  ;;  %v1040_v0 = vadd.f32 %v1032_v26, %v1006_v29 }
 0x187   :  { %v1055_v48 = vpop.permute.xlu1 %1054  ;;  %v1029_v27 = vpop.permute.xlu0 %1028 }
 0x188   :  { %v1033_v39 = vsel %vm381_vm6, %v1027_v54, %v1029_v27 }
 0x189   :  { %v1041_v9 = vadd.f32 %v1033_v39, %v1007_v14 }
 0x18b   :  { %v1059_v10 = vpop.permute.xlu1 %1058  ;;  %v1057_v56 = vpop.permute.xlu0 %1056 }
 0x18c   :  { %v1064_v5 = vsel %vm416_vm7, %v1055_v48, %v1057_v56  ;;  %v1065_v31 = vsel %vm416_vm7, %v1057_v56, %v1059_v10 }
 0x18d   :  { %v1072_v24 = vadd.f32 %v1064_v5, %v1038_v52  ;;  %v1073_v30 = vadd.f32 %v1065_v31, %v1039_v1 }
 0x18f   :  { %v1063_v19 = vpop.permute.xlu1 %1062  ;;  %v1061_v41 = vpop.permute.xlu0 %1060 }
 0x190   :  { %v1066_v55 = vsel %vm416_vm7, %v1059_v10, %v1061_v41  ;;  %v1067_v11 = vsel %vm416_vm7, %v1061_v41, %v1063_v19 }
 0x191   :  { %v1074_v21 = vadd.f32 %v1066_v55, %v1040_v0  ;;  %v1075_v40 = vadd.f32 %v1067_v11, %v1041_v9 }
 0x193   :  { %v1091_v62 = vpop.permute.xlu1 %1090  ;;  %v1089_v60 = vpop.permute.xlu0 %1088 }
 0x194   :  { %v1098_v51 = vsel %vm451_vm8, %v1089_v60, %v1091_v62 }
 0x195   :  { %v1106_v22 = vadd.f32 %v1098_v51, %v1072_v24 }
 0x197   :  { %v1095_v35 = vpop.permute.xlu1 %1094  ;;  %v1093_v3 = vpop.permute.xlu0 %1092  ;;  %v1123_v49 = vadd.f32 %v1119_v23, %v1106_v22 }
 0x198   :  { %v1099_v2 = vsel %vm451_vm8, %v1091_v62, %v1093_v3  ;;  %v1100_v7 = vsel %vm451_vm8, %v1093_v3, %v1095_v35 }
 0x199   :  { %v1107_v18 = vadd.f32 %v1099_v2, %v1073_v30  ;;  %v1108_v4 = vadd.f32 %v1100_v7, %v1074_v21 }
 0x19b   :  { %v1140_v44 = vpop.permute.xlu1 %1139  ;;  %v1097_v32 = vpop.permute.xlu0 %1096  ;;  %v1124_v38 = vadd.f32 %v1120_v15, %v1107_v18  ;;  %v1125_v45 = vadd.f32 %v1121_v13, %v1108_v4 }
 0x19c   :  { %v1101_v36 = vsel %vm451_vm8, %v1095_v35, %v1097_v32 }
 0x19d   :  { %v1109_v57 = vadd.f32 %v1101_v36, %v1075_v40 }
 0x19f   :  { %v1144_v34 = vpop.permute.xlu1 %1143  ;;  %v1142_v63 = vpop.permute.xlu0 %1141  ;;  %v1126_v61 = vadd.f32 %v1122_v42, %v1109_v57 }
 0x1a0   :  { %v1149_v43 = vsel %vm171_vm0, %v1140_v44, %v1142_v63  ;;  %v1150_v50 = vsel %vm171_vm0, %v1142_v63, %v1144_v34 }
 0x1a1   :  { %v2510_v17 = vadd.f32 %v1149_v43, %v1123_v49  ;;  %v2512_v12 = vadd.f32 %v1150_v50, %v1124_v38 }
 0x1a3   :  { %v1148_v6 = vpop.permute.xlu1 %1147  ;;  %v1146_v16 = vpop.permute.xlu0 %1145 }
 0x1a4   :  { %v1151_v20 = vsel %vm171_vm0, %v1144_v34, %v1146_v16  ;;  %v1152_v25 = vsel %vm171_vm0, %v1146_v16, %v1148_v6 }
 0x1a5   :  { %v1159_v29 = vadd.f32 %v1151_v20, %v1125_v45  ;;  %v1160_v47 = vadd.f32 %v1152_v25, %v1126_v61 }
 0x1a7   :  { %v1176_v14 = vpop.permute.xlu1 %1175  ;;  %v1174_v53 = vpop.permute.xlu0 %1173 }
 0x1a8   :  { %v1183_v13 = vsel %vm206_vm1, %v1174_v53, %v1176_v14 }
 0x1a9   :  { %v1191_v20 = vadd.f32 %v1183_v13, %v2510_v17 }
 0x1ab   :  { %v1180_v8 = vpop.permute.xlu1 %1179  ;;  %v1178_v33 = vpop.permute.xlu0 %1177 }
 0x1ac   :  { %v1185_v28 = vsel %vm206_vm1, %v1178_v33, %v1180_v8  ;;  %v1184_v42 = vsel %vm206_vm1, %v1176_v14, %v1178_v33 }
 0x1ad   :  { %v1193_v59 = vadd.f32 %v1185_v28, %v1159_v29  ;;  %v1192_v25 = vadd.f32 %v1184_v42, %v2512_v12 }
 0x1af   :  { %v1208_v52 = vpop.permute.xlu1 %1207  ;;  %v1182_v54 = vpop.permute.xlu0 %1181 }
 0x1b0   :  { %v1186_v58 = vsel %vm206_vm1, %v1180_v8, %v1182_v54 }
 0x1b1   :  { %v1194_v46 = vadd.f32 %v1186_v58, %v1160_v47 }
 0x1b3   :  { %v1212_v26 = vpop.permute.xlu1 %1211  ;;  %v1210_v1 = vpop.permute.xlu0 %1209 }
 0x1b4   :  { %v1217_v45 = vsel %vm241_vm2, %v1208_v52, %v1210_v1  ;;  %v1218_v61 = vsel %vm241_vm2, %v1210_v1, %v1212_v26 }
 0x1b5   :  { %v1225_v8 = vadd.f32 %v1217_v45, %v1191_v20  ;;  %v1226_v33 = vadd.f32 %v1218_v61, %v1192_v25 }
 0x1b7   :  { %v1216_v0 = vpop.permute.xlu1 %1215  ;;  %v1214_v48 = vpop.permute.xlu0 %1213 }
 0x1b8   :  { %v1219_v27 = vsel %vm241_vm2, %v1212_v26, %v1214_v48  ;;  %v1220_v39 = vsel %vm241_vm2, %v1214_v48, %v1216_v0 }
 0x1b9   :  { %v1227_v9 = vadd.f32 %v1219_v27, %v1193_v59  ;;  %v1228_v10 = vadd.f32 %v1220_v39, %v1194_v46 }
 0x1bb   :  { %v1244_v56 = vpop.permute.xlu1 %1243  ;;  %v1242_v5 = vpop.permute.xlu0 %1241 }
 0x1bc   :  { %v1251_v53 = vsel %vm276_vm3, %v1242_v5, %v1244_v56 }
 0x1bd   :  { %v1259_v54 = vadd.f32 %v1251_v53, %v1225_v8 }
 0x1bf   :  { %v1248_v31 = vpop.permute.xlu1 %1247  ;;  %v1246_v24 = vpop.permute.xlu0 %1245 }
 0x1c0   :  { %v1253_v30 = vsel %vm276_vm3, %v1246_v24, %v1248_v31  ;;  %v1252_v14 = vsel %vm276_vm3, %v1244_v56, %v1246_v24 }
 0x1c1   :  { %v1261_v19 = vadd.f32 %v1253_v30, %v1227_v9  ;;  %v1260_v52 = vadd.f32 %v1252_v14, %v1226_v33 }
 0x1c3   :  { %v1276_v41 = vpop.permute.xlu1 %1275  ;;  %v1250_v55 = vpop.permute.xlu0 %1249 }
 0x1c4   :  { %v1254_v11 = vsel %vm276_vm3, %v1248_v31, %v1250_v55 }
 0x1c5   :  { %v1262_v21 = vadd.f32 %v1254_v11, %v1228_v10 }
 0x1c7   :  { %v1280_v40 = vpop.permute.xlu1 %1279  ;;  %v1278_v62 = vpop.permute.xlu0 %1277 }
 0x1c8   :  { %v1285_v28 = vsel %vm311_vm4, %v1276_v41, %v1278_v62  ;;  %v1286_v59 = vsel %vm311_vm4, %v1278_v62, %v1280_v40 }
 0x1c9   :  { %v1293_v1 = vadd.f32 %v1285_v28, %v1259_v54  ;;  %v1294_v0 = vadd.f32 %v1286_v59, %v1260_v52 }
 0x1cb   :  { %v1284_v60 = vpop.permute.xlu1 %1283  ;;  %v1282_v51 = vpop.permute.xlu0 %1281 }
 0x1cc   :  { %v1287_v22 = vsel %vm311_vm4, %v1280_v40, %v1282_v51  ;;  %v1288_v35 = vsel %vm311_vm4, %v1282_v51, %v1284_v60 }
 0x1cd   :  { %v1295_v3 = vadd.f32 %v1287_v22, %v1261_v19  ;;  %v1296_v2 = vadd.f32 %v1288_v35, %v1262_v21 }
 0x1cf   :  { %v1312_v7 = vpop.permute.xlu1 %1311  ;;  %v1310_v37 = vpop.permute.xlu0 %1309 }
 0x1d0   :  { %v1319_v17 = vsel %vm346_vm5, %v1310_v37, %v1312_v7 }
 0x1d1   :  { %v1327_v9 = vadd.f32 %v1319_v17, %v1293_v1 }
 0x1d3   :  { %v1316_v18 = vpop.permute.xlu1 %1315  ;;  %v1314_v4 = vpop.permute.xlu0 %1313 }
 0x1d4   :  { %v1321_v44 = vsel %vm346_vm5, %v1314_v4, %v1316_v18  ;;  %v1320_v12 = vsel %vm346_vm5, %v1312_v7, %v1314_v4 }
 0x1d5   :  { %v1329_v32 = vadd.f32 %v1321_v44, %v1295_v3  ;;  %v1328_v10 = vadd.f32 %v1320_v12, %v1294_v0 }
 0x1d7   :  { %v1344_v23 = vpop.permute.xlu1 %1343  ;;  %v1318_v15 = vpop.permute.xlu0 %1317 }
 0x1d8   :  { %v1322_v36 = vsel %vm346_vm5, %v1316_v18, %v1318_v15 }
 0x1d9   :  { %v1330_v57 = vadd.f32 %v1322_v36, %v1296_v2 }
 0x1db   :  { %v1348_v34 = vpop.permute.xlu1 %1347  ;;  %v1346_v63 = vpop.permute.xlu0 %1345 }
 0x1dc   :  { %v1353_v27 = vsel %vm381_vm6, %v1344_v23, %v1346_v63  ;;  %v1354_v39 = vsel %vm381_vm6, %v1346_v63, %v1348_v34 }
 0x1dd   :  { %v1361_v19 = vadd.f32 %v1353_v27, %v1327_v9  ;;  %v1362_v41 = vadd.f32 %v1354_v39, %v1328_v10 }
 0x1df   :  { %v1352_v49 = vpop.permute.xlu1 %1351  ;;  %v1350_v38 = vpop.permute.xlu0 %1349 }
 0x1e0   :  { %v1355_v43 = vsel %vm381_vm6, %v1348_v34, %v1350_v38  ;;  %v1356_v50 = vsel %vm381_vm6, %v1350_v38, %v1352_v49 }
 0x1e1   :  { %v1363_v6 = vadd.f32 %v1355_v43, %v1329_v32  ;;  %v1364_v16 = vadd.f32 %v1356_v50, %v1330_v57 }
 0x1e3   :  { %v1380_v29 = vpop.permute.xlu1 %1379  ;;  %v1378_v47 = vpop.permute.xlu0 %1377 }
 0x1e4   :  { %v1387_v31 = vsel %vm416_vm7, %v1378_v47, %v1380_v29 }
 0x1e5   :  { %v1395_v11 = vadd.f32 %v1387_v31, %v1361_v19 }
 0x1e7   :  { %v1384_v58 = vpop.permute.xlu1 %1383  ;;  %v1382_v46 = vpop.permute.xlu0 %1381 }
 0x1e8   :  { %v1389_v26 = vsel %vm416_vm7, %v1382_v46, %v1384_v58  ;;  %v1388_v24 = vsel %vm416_vm7, %v1380_v29, %v1382_v46 }
 0x1e9   :  { %v1397_v48 = vadd.f32 %v1389_v26, %v1363_v6  ;;  %v1396_v21 = vadd.f32 %v1388_v24, %v1362_v41 }
 0x1eb   :  { %v1412_v56 = vpop.permute.xlu1 %1411  ;;  %v1386_v5 = vpop.permute.xlu0 %1385 }
 0x1ec   :  { %v1390_v30 = vsel %vm416_vm7, %v1384_v58, %v1386_v5 }
 0x1ed   :  { %v1398_v55 = vadd.f32 %v1390_v30, %v1364_v16 }
 0x1ef   :  { %v1416_v40 = vpop.permute.xlu1 %1415  ;;  %v1414_v62 = vpop.permute.xlu0 %1413 }
 0x1f0   :  { %v1421_v60 = vsel %vm451_vm8, %v1412_v56, %v1414_v62  ;;  %v1422_v51 = vsel %vm451_vm8, %v1414_v62, %v1416_v40 }
 0x1f1   :  { %v1429_v22 = vadd.f32 %v1421_v60, %v1395_v11  ;;  %v1430_v35 = vadd.f32 %v1422_v51, %v1396_v21 }
 0x1f3   :  { %v1433_v3 = vmax.f32 %v1429_v22, 0.0  ;;  %v1434_v2 = vmax.f32 %v1430_v35, 0.0  ;;  %v1420_v7 = vpop.permute.xlu1 %1419  ;;  %v1418_v37 = vpop.permute.xlu0 %1417 }
 0x1f4   :  { %v1423_v18 = vsel %vm451_vm8, %v1416_v40, %v1418_v37  ;;  %v1424_v4 = vsel %vm451_vm8, %v1418_v37, %v1420_v7 }
 0x1f5   :  { %1437 = vst [vmem:[%s2566_s4] sm:$0xff] %v1433_v3  ;;  %1438 = vst [vmem:[%s2566_s4 + $0x8] sm:$0xff] %v1434_v2  ;;  %v1431_v44 = vadd.f32 %v1423_v18, %v1397_v48  ;;  %v1432_v32 = vadd.f32 %v1424_v4, %v1398_v55 }
 0x1f7   :  { %v1435_v23 = vmax.f32 %v1431_v44, 0.0  ;;  %v1436_v15 = vmax.f32 %v1432_v32, 0.0 }
 0x1f9   :  { %1439 = vst [vmem:[%s2566_s4 + $0x10] sm:$0xff] %v1435_v23  ;;  %1440 = vst [vmem:[%s2566_s4 + $0x18] sm:$0xff] %v1436_v15 }
 0x1fa   :  { %1445 = vsyncpa [#allocation4], 1 }

</bundles_post_ra>
